<compile_context>
chip_gen: v5e
topology: v5e:2x2
jax: 0.10.0
libtpu: 0.0.40
codegen_flags: <defaults>
</compile_context>

<pallas_src>
import math

import jax
import jax.numpy as jnp
import numpy as np
from jax.experimental import pallas as pl

# ---- small model dims (consistent with the PyTorch module's forward) ----
B, S = 2, 8            # batch, sequence length
D = 32                 # d_model
H = 4                  # attention heads
HD = D // H            # head dim
FF = 4 * D             # MLP hidden (zoology default hidden_mult=4)
L = 2                  # n_layers
V = 128                # vocab size (multiple of pad_vocab_size_multiple, lane-dense)
N = B * S              # flattened token count
EPS = 1e-5             # LayerNorm eps (torch default / layer_norm_epsilon)
SCALE = 1.0 / math.sqrt(HD)
MASK_VALUE = -1e30     # finite negative mask (avoids IEEE -inf on the VPU)
LANE = 128             # lane width of the packed parameter slab

assert S & (S - 1) == 0, "S must be a power of two for the shift-based mask"
LOG2_S = S.bit_length() - 1

# ---- packed-vector slab layout: 9 rows per layer + 2 final rows -------------
RPL = 9
R_LN1W, R_LN1B, R_LN2W, R_LN2B, R_BQK, R_BO, R_B1, R_B2, R_BVO = range(RPL)
VEC_ROWS = L * RPL + 2          # trailing rows: lnfw, lnfb


def _layernorm(x, w, b):
    mu = jnp.mean(x, axis=-1, keepdims=True)
    var = jnp.mean((x - mu) ** 2, axis=-1, keepdims=True)
    return (x - mu) * jax.lax.rsqrt(var + EPS) * w + b


def _gelu_tanh(x):
    # TODO(synk): torch F.gelu default is the exact erf form; the tanh
    # approximation is used for robust Mosaic lowering (reference uses the same).
    c = math.sqrt(2.0 / math.pi)
    return 0.5 * x * (1.0 + jnp.tanh(c * (x + 0.044715 * x * x * x)))


def lm_kernel(ids_ref, wte_ref, wte_t_ref, wpe_ref, vecs_ref,
              wqk_ref, wvo_ref, w1_ref, w2_ref, out_ref):
    # ---- embeddings: one-hot @ table (MXU-friendly gather) + positional emb ----
    ids = ids_ref[...]                                            # (N, 1) int32
    vocab_iota = jax.lax.broadcasted_iota(jnp.int32, (N, V), 1)
    one_hot = (vocab_iota == ids).astype(jnp.float32)             # (N, V)
    resid = jnp.dot(one_hot, wte_ref[...],
                    preferred_element_type=jnp.float32) + wpe_ref[...]   # (N, D)
    # drop_i / drop_path_i are identity at eval

    # ---- block-diagonal causal mask over the flattened (B*S) token axis ----
    # Built once (loop-invariant across layers); finite negative, not -inf.
    r = jax.lax.broadcasted_iota(jnp.int32, (N, N), 0)
    c = jax.lax.broadcasted_iota(jnp.int32, (N, N), 1)
    allowed = ((r >> LOG2_S) == (c >> LOG2_S)) & (r >= c)
    mask_bias = jnp.where(allowed, 0.0, MASK_VALUE)               # (N, N) f32

    vecs = vecs_ref[...]                                          # (VEC_ROWS, 128)

    for l in range(L):                              # static layer loop (L=2)
        base = l * RPL
        # --------- norm1 + causal multi-head self-attention (sequence mixer) ---
        x = _layernorm(resid, vecs[base + R_LN1W, :D], vecs[base + R_LN1B, :D])
        # Q/K projection (scale pre-folded into Q columns) and the folded V*Wo
        # projection; vprime_h = (x @ Wv_h + bv_h) @ Wo_h, concatenated per head.
        qk = jnp.dot(x, wqk_ref[l],
                     preferred_element_type=jnp.float32) + vecs[base + R_BQK, :2 * D]
        vprime = jnp.dot(x, wvo_ref[l],
                         preferred_element_type=jnp.float32) + vecs[base + R_BVO, :]
        q = jnp.stack([qk[:, h * HD:(h + 1) * HD] for h in range(H)], axis=0)
        k = jnp.stack([qk[:, D + h * HD: D + (h + 1) * HD] for h in range(H)], axis=0)
        s = jnp.einsum('hqd,hkd->hqk', q, k,
                       preferred_element_type=jnp.float32)        # (H, N, N)
        s = s + mask_bias[None, :, :]
        s = s - jnp.max(s, axis=-1, keepdims=True)
        p = jnp.exp(s)
        p = p * pl.reciprocal(jnp.sum(p, axis=-1, keepdims=True), approx=True)
        attn = jnp.zeros((N, D), jnp.float32)
        for h in range(H):                          # head merge: sum_h p_h @ v'_h
            attn = attn + jnp.dot(p[h], vprime[:, h * D:(h + 1) * D],
                                  preferred_element_type=jnp.float32)
        resid = resid + attn + vecs[base + R_BO, :D]   # dropout1/drop_path1 id.

        # --------------- norm2 + MLP with GELU (state mixer) -------------------
        hmlp = _layernorm(resid, vecs[base + R_LN2W, :D], vecs[base + R_LN2B, :D])
        hmlp = jnp.dot(hmlp, w1_ref[l],
                       preferred_element_type=jnp.float32) + vecs[base + R_B1, :]
        hmlp = _gelu_tanh(hmlp)
        hmlp = jnp.dot(hmlp, w2_ref[l],
                       preferred_element_type=jnp.float32) + vecs[base + R_B2, :D]
        resid = resid + hmlp                           # dropout2/drop_path2 id.

    # ---- final LayerNorm + weight-tied lm_head -> lane-dense (N, V) logits ----
    hf = _layernorm(resid, vecs[L * RPL, :D], vecs[L * RPL + 1, :D])
    out_ref[...] = jnp.dot(hf, wte_t_ref[...], preferred_element_type=jnp.float32)


def prepare_kernel_params(wte, wpe, layer_params, lnfw, lnfb):
    """One-time parameter plumbing for the fused kernel:
      * stack per-layer params along a leading L axis,
      * fold the 1/sqrt(HD) attention scale into the Q columns of Wqk/bqk,
      * fold Wo into the V projection:  Wvo_h = Wv_h @ Wo_h  ->  (L, D, H*D),
        bvo_h = bv_h @ Wo_h                                   ->  (L, 1, H*D),
      * pack every small vector parameter into ONE lane-dense (VEC_ROWS, 128)
        slab (one DMA instead of ~12),
      * pre-transpose wte for the lm_head, pre-tile wpe across the batch."""
    def stk(i):
        return jnp.stack([lp[i] for lp in layer_params], axis=0)
    ln1w, ln1b, wqkv, bqkv, wo, bo, ln2w, ln2b, w1, b1, w2, b2 = (
        stk(i) for i in range(12))

    qk_scale = jnp.concatenate([jnp.full((D,), SCALE, jnp.float32),
                                jnp.ones((D,), jnp.float32)])
    wqk = wqkv[:, :, :2 * D] * qk_scale                 # (L, D, 2D)
    bqk = bqkv[:, :, :2 * D] * qk_scale                 # (L, 1, 2D)

    wv = wqkv[:, :, 2 * D:]                             # (L, D, D)
    bv = bqkv[:, :, 2 * D:]                             # (L, 1, D)
    wvo_blocks, bvo_blocks = [], []
    for h in range(H):
        wo_h = wo[:, h * HD:(h + 1) * HD, :]            # (L, HD, D)
        wvo_blocks.append(jnp.einsum('lde,lef->ldf', wv[:, :, h * HD:(h + 1) * HD], wo_h))
        bvo_blocks.append(jnp.einsum('lxe,lef->lxf', bv[:, :, h * HD:(h + 1) * HD], wo_h))
    wvo = jnp.concatenate(wvo_blocks, axis=-1)          # (L, D, H*D = 128)
    bvo = jnp.concatenate(bvo_blocks, axis=-1)          # (L, 1, H*D)

    def pad_row(x):                                     # (1, w) -> (1, 128)
        return jnp.pad(x, ((0, 0), (0, LANE - x.shape[-1])))

    rows = []
    for l in range(L):
        rows += [pad_row(ln1w[l]), pad_row(ln1b[l]),
                 pad_row(ln2w[l]), pad_row(ln2b[l]),
                 pad_row(bqk[l]), pad_row(bo[l]),
                 pad_row(b1[l]), pad_row(b2[l]), pad_row(bvo[l])]
    rows += [pad_row(lnfw), pad_row(lnfb)]
    vecs = jnp.concatenate(rows, axis=0)                # (VEC_ROWS, 128)

    wte_t = wte.T                                       # (D, V) for the lm_head
    wpe_tiled = jnp.tile(wpe, (B, 1))                   # (B*S, D)
    return (wte, wte_t, wpe_tiled, vecs, wqk, wvo, w1, w2)


def language_model_forward(input_ids, wte, wpe, layer_params, lnfw, lnfb):
    kernel_args = prepare_kernel_params(wte, wpe, layer_params, lnfw, lnfb)
    ids_flat = input_ids.reshape(N, 1).astype(jnp.int32)
    # Single invocation, no grid: every operand lives whole in VMEM (<1 MiB total),
    # so there is no per-step pipeline overhead; only 10 operand DMAs per call.
    logits = pl.pallas_call(
        lm_kernel,
        out_shape=jax.ShapeDtypeStruct((N, V), jnp.float32),
    )(ids_flat, *kernel_args)
    return logits.reshape(B, S, V)


# ---------------- pure-JAX reference (torch-like semantics) ----------------
def reference_language_model(input_ids, wte, wpe, layer_params, lnfw, lnfb):
    emb = wte[input_ids] + wpe[None, :, :]                # (B, S, D)
    causal = jnp.asarray(np.tril(np.ones((S, S), dtype=bool)))
    outs = []
    for b in range(B):
        resid = emb[b]
        for (ln1w, ln1b, wqkv, bqkv, wo, bo,
             ln2w, ln2b, w1, b1, w2, b2) in layer_params:
            hh_ = _layernorm(resid, ln1w, ln1b)
            qkv = hh_ @ wqkv + bqkv
            q, k, v = qkv[:, :D], qkv[:, D:2 * D], qkv[:, 2 * D:]
            heads = []
            for hh in range(H):
                qh = q[:, hh * HD:(hh + 1) * HD]
                kh = k[:, hh * HD:(hh + 1) * HD]
                vh = v[:, hh * HD:(hh + 1) * HD]
                s = (qh @ kh.T) * SCALE
                s = jnp.where(causal, s, -jnp.inf)
                heads.append(jax.nn.softmax(s, axis=-1) @ vh)
            attn = jnp.concatenate(heads, axis=-1) @ wo + bo
            resid = resid + attn
            h2 = _layernorm(resid, ln2w, ln2b)
            h2 = _gelu_tanh(h2 @ w1 + b1) @ w2 + b2
            resid = resid + h2
        hf = _layernorm(resid, lnfw, lnfb)
        outs.append(hf @ wte.T)                           # weight-tied lm_head
    return jnp.stack(outs, axis=0)                        # (B, S, V)


def make_params(key):
    keys = jax.random.split(key, 2 + 6 * L)
    wte = 0.02 * jax.random.normal(keys[0], (V, D), jnp.float32)
    wpe = 0.02 * jax.random.normal(keys[1], (S, D), jnp.float32)
    layer_params = []
    for l in range(L):
        k = keys[2 + 6 * l: 2 + 6 * (l + 1)]
        ln1w = jnp.ones((1, D), jnp.float32)
        ln1b = jnp.zeros((1, D), jnp.float32)
        ln2w = jnp.ones((1, D), jnp.float32)
        ln2b = jnp.zeros((1, D), jnp.float32)
        wqkv = 0.02 * jax.random.normal(k[0], (D, 3 * D), jnp.float32)
        bqkv = jnp.zeros((1, 3 * D), jnp.float32)
        wo = 0.02 * jax.random.normal(k[1], (D, D), jnp.float32)
        bo = jnp.zeros((1, D), jnp.float32)
        w1 = 0.02 * jax.random.normal(k[2], (D, FF), jnp.float32)
        b1 = 0.01 * jax.random.normal(k[3], (1, FF), jnp.float32)
        w2 = 0.02 * jax.random.normal(k[4], (FF, D), jnp.float32)
        b2 = 0.01 * jax.random.normal(k[5], (1, D), jnp.float32)
        layer_params.append((ln1w, ln1b, wqkv, bqkv, wo, bo,
                             ln2w, ln2b, w1, b1, w2, b2))
    lnfw = jnp.ones((1, D), jnp.float32)
    lnfb = jnp.zeros((1, D), jnp.float32)
    return wte, wpe, layer_params, lnfw, lnfb


if __name__ == "__main__":
    key = jax.random.PRNGKey(0)
    k_ids, k_params = jax.random.split(key)
    input_ids = jax.random.randint(k_ids, (B, S), 0, V, dtype=jnp.int32)
    wte, wpe, layer_params, lnfw, lnfb = make_params(k_params)

    logits = language_model_forward(input_ids, wte, wpe, layer_params, lnfw, lnfb)
    logits = jax.block_until_ready(logits)

    ref = reference_language_model(input_ids, wte, wpe, layer_params, lnfw, lnfb)
    # tolerance leaves headroom for the approximate softmax reciprocal (EUP vrcp)
    np.testing.assert_allclose(np.asarray(logits), np.asarray(ref),
                               rtol=2e-3, atol=2e-3)

    print("KERNEL_OK")
</pallas_src>

<mosaic_0001>
module attributes {stable_mosaic.version = 11 : i64} {
  func.func @lm_kernel(%arg0: memref<16x1xi32, #tpu.memory_space<vmem>>, %arg1: memref<128x32xf32, #tpu.memory_space<vmem>>, %arg2: memref<32x128xf32, #tpu.memory_space<vmem>>, %arg3: memref<16x32xf32, #tpu.memory_space<vmem>>, %arg4: memref<20x128xf32, #tpu.memory_space<vmem>>, %arg5: memref<2x32x64xf32, #tpu.memory_space<vmem>>, %arg6: memref<2x32x128xf32, #tpu.memory_space<vmem>>, %arg7: memref<2x32x128xf32, #tpu.memory_space<vmem>>, %arg8: memref<2x128x32xf32, #tpu.memory_space<vmem>>, %arg9: memref<16x128xf32, #tpu.memory_space<vmem>>) attributes {dimension_semantics = [], scalar_prefetch = 0 : i64, scratch_operands = 0 : i64, tpu.core_type = #tpu.core_type<tc>} {
    %c0 = arith.constant 0 : index
    %c0_0 = arith.constant 0 : index
    %0 = vector.load %arg0[%c0, %c0_0] : memref<16x1xi32, #tpu.memory_space<vmem>>, vector<16x1xi32>
    %1 = tpu.iota {dimensions = array<i32: 1>} : vector<16x128xi32>
    %2 = vector.broadcast %0 : vector<16x1xi32> to vector<16x128xi32>
    %3 = arith.cmpi eq, %1, %2 : vector<16x128xi32>
    %4 = arith.extui %3 : vector<16x128xi1> to vector<16x128xi32>
    %5 = arith.sitofp %4 : vector<16x128xi32> to vector<16x128xf32>
    %c0_1 = arith.constant 0 : index
    %c0_2 = arith.constant 0 : index
    %6 = vector.load %arg1[%c0_1, %c0_2] : memref<128x32xf32, #tpu.memory_space<vmem>>, vector<128x32xf32>
    %cst = arith.constant dense<0.000000e+00> : vector<16x32xf32>
    %7 = tpu.matmul %5, %6, %cst {dimension_numbers = #tpu.dot_dimension_numbers<[1], [0], [0], [1], [0, 0, 1, 1], [], []>} : vector<16x128xf32>, vector<128x32xf32>, vector<16x32xf32> -> vector<16x32xf32>
    %c0_3 = arith.constant 0 : index
    %c0_4 = arith.constant 0 : index
    %8 = vector.load %arg3[%c0_3, %c0_4] : memref<16x32xf32, #tpu.memory_space<vmem>>, vector<16x32xf32>
    %9 = arith.addf %7, %8 : vector<16x32xf32>
    %10 = tpu.iota {dimensions = array<i32: 0>} : vector<16x16xi32>
    %11 = tpu.iota {dimensions = array<i32: 1>} : vector<16x16xi32>
    %c3_i32 = arith.constant 3 : i32
    %12 = vector.broadcast %c3_i32 : i32 to vector<16x16xi32>
    %13 = arith.shrsi %10, %12 : vector<16x16xi32>
    %c3_i32_5 = arith.constant 3 : i32
    %14 = vector.broadcast %c3_i32_5 : i32 to vector<16x16xi32>
    %15 = arith.shrsi %11, %14 : vector<16x16xi32>
    %16 = arith.cmpi eq, %13, %15 : vector<16x16xi32>
    %17 = arith.cmpi sge, %10, %11 : vector<16x16xi32>
    %18 = arith.andi %16, %17 : vector<16x16xi1>
    %cst_6 = arith.constant 0.000000e+00 : f32
    %cst_7 = arith.constant -1.000000e+30 : f32
    %19 = vector.broadcast %cst_6 : f32 to vector<16x16xf32>
    %20 = vector.broadcast %cst_7 : f32 to vector<16x16xf32>
    %21 = arith.select %18, %19, %20 : vector<16x16xi1>, vector<16x16xf32>
    %c0_8 = arith.constant 0 : index
    %c0_9 = arith.constant 0 : index
    %22 = vector.load %arg4[%c0_8, %c0_9] : memref<20x128xf32, #tpu.memory_space<vmem>>, vector<20x128xf32>
    %23 = vector.extract_strided_slice %22 {offsets = [0, 0], sizes = [1, 32], strides = [1, 1]} : vector<20x128xf32> to vector<1x32xf32>
    %24 = vector.shape_cast %23 : vector<1x32xf32> to vector<32xf32>
    %25 = vector.extract_strided_slice %22 {offsets = [1, 0], sizes = [1, 32], strides = [1, 1]} : vector<20x128xf32> to vector<1x32xf32>
    %26 = vector.shape_cast %25 : vector<1x32xf32> to vector<32xf32>
    %cst_10 = arith.constant dense<0.000000e+00> : vector<16xf32>
    %27 = vector.multi_reduction <add>, %9, %cst_10 [1] : vector<16x32xf32> to vector<16xf32>
    %28 = vector.shape_cast %27 : vector<16xf32> to vector<16x1xf32>
    %cst_11 = arith.constant 3.200000e+01 : f32
    %29 = vector.broadcast %cst_11 : f32 to vector<16x1xf32>
    %30 = arith.divf %28, %29 : vector<16x1xf32>
    %31 = vector.broadcast %30 : vector<16x1xf32> to vector<16x32xf32>
    %32 = arith.subf %9, %31 : vector<16x32xf32>
    %33 = arith.mulf %32, %32 : vector<16x32xf32>
    %cst_12 = arith.constant dense<0.000000e+00> : vector<16xf32>
    %34 = vector.multi_reduction <add>, %33, %cst_12 [1] : vector<16x32xf32> to vector<16xf32>
    %35 = vector.shape_cast %34 : vector<16xf32> to vector<16x1xf32>
    %cst_13 = arith.constant 3.200000e+01 : f32
    %36 = vector.broadcast %cst_13 : f32 to vector<16x1xf32>
    %37 = arith.divf %35, %36 : vector<16x1xf32>
    %38 = vector.broadcast %30 : vector<16x1xf32> to vector<16x32xf32>
    %39 = arith.subf %9, %38 : vector<16x32xf32>
    %cst_14 = arith.constant 9.99999974E-6 : f32
    %40 = vector.broadcast %cst_14 : f32 to vector<16x1xf32>
    %41 = arith.addf %37, %40 : vector<16x1xf32>
    %42 = math.rsqrt %41 : vector<16x1xf32>
    %43 = vector.broadcast %42 : vector<16x1xf32> to vector<16x32xf32>
    %44 = arith.mulf %39, %43 : vector<16x32xf32>
    %45 = vector.shape_cast %24 : vector<32xf32> to vector<1x32xf32>
    %46 = vector.broadcast %45 : vector<1x32xf32> to vector<16x32xf32>
    %47 = arith.mulf %44, %46 : vector<16x32xf32>
    %48 = vector.shape_cast %26 : vector<32xf32> to vector<1x32xf32>
    %49 = vector.broadcast %48 : vector<1x32xf32> to vector<16x32xf32>
    %50 = arith.addf %47, %49 : vector<16x32xf32>
    %c0_15 = arith.constant 0 : index
    %c0_16 = arith.constant 0 : index
    %c0_17 = arith.constant 0 : index
    %51 = vector.load %arg5[%c0_15, %c0_16, %c0_17] : memref<2x32x64xf32, #tpu.memory_space<vmem>>, vector<1x32x64xf32>
    %52 = vector.shape_cast %51 : vector<1x32x64xf32> to vector<32x64xf32>
    %cst_18 = arith.constant dense<0.000000e+00> : vector<16x64xf32>
    %53 = tpu.matmul %50, %52, %cst_18 {dimension_numbers = #tpu.dot_dimension_numbers<[1], [0], [0], [1], [0, 0, 1, 1], [], []>} : vector<16x32xf32>, vector<32x64xf32>, vector<16x64xf32> -> vector<16x64xf32>
    %54 = vector.extract_strided_slice %22 {offsets = [4, 0], sizes = [1, 64], strides = [1, 1]} : vector<20x128xf32> to vector<1x64xf32>
    %55 = vector.shape_cast %54 : vector<1x64xf32> to vector<64xf32>
    %56 = vector.shape_cast %55 : vector<64xf32> to vector<1x64xf32>
    %57 = vector.broadcast %56 : vector<1x64xf32> to vector<16x64xf32>
    %58 = arith.addf %53, %57 : vector<16x64xf32>
    %c0_19 = arith.constant 0 : index
    %c0_20 = arith.constant 0 : index
    %c0_21 = arith.constant 0 : index
    %59 = vector.load %arg6[%c0_19, %c0_20, %c0_21] : memref<2x32x128xf32, #tpu.memory_space<vmem>>, vector<1x32x128xf32>
    %60 = vector.shape_cast %59 : vector<1x32x128xf32> to vector<32x128xf32>
    %cst_22 = arith.constant dense<0.000000e+00> : vector<16x128xf32>
    %61 = tpu.matmul %50, %60, %cst_22 {dimension_numbers = #tpu.dot_dimension_numbers<[1], [0], [0], [1], [0, 0, 1, 1], [], []>} : vector<16x32xf32>, vector<32x128xf32>, vector<16x128xf32> -> vector<16x128xf32>
    %62 = vector.extract_strided_slice %22 {offsets = [8, 0], sizes = [1, 128], strides = [1, 1]} : vector<20x128xf32> to vector<1x128xf32>
    %63 = vector.shape_cast %62 : vector<1x128xf32> to vector<128xf32>
    %64 = vector.shape_cast %63 : vector<128xf32> to vector<1x128xf32>
    %65 = vector.broadcast %64 : vector<1x128xf32> to vector<16x128xf32>
    %66 = arith.addf %61, %65 : vector<16x128xf32>
    %67 = vector.extract_strided_slice %58 {offsets = [0, 0], sizes = [16, 8], strides = [1, 1]} : vector<16x64xf32> to vector<16x8xf32>
    %68 = vector.extract_strided_slice %58 {offsets = [0, 8], sizes = [16, 8], strides = [1, 1]} : vector<16x64xf32> to vector<16x8xf32>
    %69 = vector.extract_strided_slice %58 {offsets = [0, 16], sizes = [16, 8], strides = [1, 1]} : vector<16x64xf32> to vector<16x8xf32>
    %70 = vector.extract_strided_slice %58 {offsets = [0, 24], sizes = [16, 8], strides = [1, 1]} : vector<16x64xf32> to vector<16x8xf32>
    %71 = vector.shape_cast %67 : vector<16x8xf32> to vector<1x16x8xf32>
    %72 = vector.shape_cast %68 : vector<16x8xf32> to vector<1x16x8xf32>
    %73 = vector.shape_cast %69 : vector<16x8xf32> to vector<1x16x8xf32>
    %74 = vector.shape_cast %70 : vector<16x8xf32> to vector<1x16x8xf32>
    %75 = tpu.concatenate %71, %72, %73, %74 in 0 : vector<1x16x8xf32>, vector<1x16x8xf32>, vector<1x16x8xf32>, vector<1x16x8xf32> -> vector<4x16x8xf32>
    %76 = vector.extract_strided_slice %58 {offsets = [0, 32], sizes = [16, 8], strides = [1, 1]} : vector<16x64xf32> to vector<16x8xf32>
    %77 = vector.extract_strided_slice %58 {offsets = [0, 40], sizes = [16, 8], strides = [1, 1]} : vector<16x64xf32> to vector<16x8xf32>
    %78 = vector.extract_strided_slice %58 {offsets = [0, 48], sizes = [16, 8], strides = [1, 1]} : vector<16x64xf32> to vector<16x8xf32>
    %79 = vector.extract_strided_slice %58 {offsets = [0, 56], sizes = [16, 8], strides = [1, 1]} : vector<16x64xf32> to vector<16x8xf32>
    %80 = vector.shape_cast %76 : vector<16x8xf32> to vector<1x16x8xf32>
    %81 = vector.shape_cast %77 : vector<16x8xf32> to vector<1x16x8xf32>
    %82 = vector.shape_cast %78 : vector<16x8xf32> to vector<1x16x8xf32>
    %83 = vector.shape_cast %79 : vector<16x8xf32> to vector<1x16x8xf32>
    %84 = tpu.concatenate %80, %81, %82, %83 in 0 : vector<1x16x8xf32>, vector<1x16x8xf32>, vector<1x16x8xf32>, vector<1x16x8xf32> -> vector<4x16x8xf32>
    "tpu.trace_start"() <{level = 10 : i32, message = "hqd,hkd->hqk"}> : () -> ()
    %cst_23 = arith.constant dense<0.000000e+00> : vector<4x16x16xf32>
    %85 = tpu.matmul %75, %84, %cst_23 {dimension_numbers = #tpu.dot_dimension_numbers<[2], [2], [1], [1], [0, 0, 0, 1, 1, 1], [0], [0]>} : vector<4x16x8xf32>, vector<4x16x8xf32>, vector<4x16x16xf32> -> vector<4x16x16xf32>
    "tpu.trace_stop"() : () -> ()
    %86 = vector.shape_cast %21 : vector<16x16xf32> to vector<1x16x16xf32>
    %87 = vector.broadcast %86 : vector<1x16x16xf32> to vector<4x16x16xf32>
    %88 = arith.addf %85, %87 : vector<4x16x16xf32>
    %cst_24 = arith.constant dense<0xFF800000> : vector<4x16xf32>
    %89 = vector.multi_reduction <maximumf>, %88, %cst_24 [2] : vector<4x16x16xf32> to vector<4x16xf32>
    %90 = vector.shape_cast %89 : vector<4x16xf32> to vector<4x16x1xf32>
    %91 = vector.broadcast %90 : vector<4x16x1xf32> to vector<4x16x16xf32>
    %92 = arith.subf %88, %91 : vector<4x16x16xf32>
    %93 = math.exp %92 : vector<4x16x16xf32>
    %cst_25 = arith.constant dense<0.000000e+00> : vector<4x16xf32>
    %94 = vector.multi_reduction <add>, %93, %cst_25 [2] : vector<4x16x16xf32> to vector<4x16xf32>
    %95 = vector.shape_cast %94 : vector<4x16xf32> to vector<4x16x1xf32>
    %96 = tpu.reciprocal %95 {approx = true} : vector<4x16x1xf32> -> vector<4x16x1xf32>
    %97 = vector.broadcast %96 : vector<4x16x1xf32> to vector<4x16x16xf32>
    %98 = arith.mulf %93, %97 : vector<4x16x16xf32>
    %cst_26 = arith.constant 0.000000e+00 : f32
    %99 = vector.broadcast %cst_26 : f32 to vector<16x32xf32>
    %100 = vector.extract_strided_slice %98 {offsets = [0, 0, 0], sizes = [1, 16, 16], strides = [1, 1, 1]} : vector<4x16x16xf32> to vector<1x16x16xf32>
    %101 = vector.shape_cast %100 : vector<1x16x16xf32> to vector<16x16xf32>
    %102 = vector.extract_strided_slice %66 {offsets = [0, 0], sizes = [16, 32], strides = [1, 1]} : vector<16x128xf32> to vector<16x32xf32>
    %cst_27 = arith.constant dense<0.000000e+00> : vector<16x32xf32>
    %103 = tpu.matmul %101, %102, %cst_27 {dimension_numbers = #tpu.dot_dimension_numbers<[1], [0], [0], [1], [0, 0, 1, 1], [], []>} : vector<16x16xf32>, vector<16x32xf32>, vector<16x32xf32> -> vector<16x32xf32>
    %104 = arith.addf %99, %103 : vector<16x32xf32>
    %105 = vector.extract_strided_slice %98 {offsets = [1, 0, 0], sizes = [1, 16, 16], strides = [1, 1, 1]} : vector<4x16x16xf32> to vector<1x16x16xf32>
    %106 = vector.shape_cast %105 : vector<1x16x16xf32> to vector<16x16xf32>
    %107 = vector.extract_strided_slice %66 {offsets = [0, 32], sizes = [16, 32], strides = [1, 1]} : vector<16x128xf32> to vector<16x32xf32>
    %cst_28 = arith.constant dense<0.000000e+00> : vector<16x32xf32>
    %108 = tpu.matmul %106, %107, %cst_28 {dimension_numbers = #tpu.dot_dimension_numbers<[1], [0], [0], [1], [0, 0, 1, 1], [], []>} : vector<16x16xf32>, vector<16x32xf32>, vector<16x32xf32> -> vector<16x32xf32>
    %109 = arith.addf %104, %108 : vector<16x32xf32>
    %110 = vector.extract_strided_slice %98 {offsets = [2, 0, 0], sizes = [1, 16, 16], strides = [1, 1, 1]} : vector<4x16x16xf32> to vector<1x16x16xf32>
    %111 = vector.shape_cast %110 : vector<1x16x16xf32> to vector<16x16xf32>
    %112 = vector.extract_strided_slice %66 {offsets = [0, 64], sizes = [16, 32], strides = [1, 1]} : vector<16x128xf32> to vector<16x32xf32>
    %cst_29 = arith.constant dense<0.000000e+00> : vector<16x32xf32>
    %113 = tpu.matmul %111, %112, %cst_29 {dimension_numbers = #tpu.dot_dimension_numbers<[1], [0], [0], [1], [0, 0, 1, 1], [], []>} : vector<16x16xf32>, vector<16x32xf32>, vector<16x32xf32> -> vector<16x32xf32>
    %114 = arith.addf %109, %113 : vector<16x32xf32>
    %115 = vector.extract_strided_slice %98 {offsets = [3, 0, 0], sizes = [1, 16, 16], strides = [1, 1, 1]} : vector<4x16x16xf32> to vector<1x16x16xf32>
    %116 = vector.shape_cast %115 : vector<1x16x16xf32> to vector<16x16xf32>
    %117 = vector.extract_strided_slice %66 {offsets = [0, 96], sizes = [16, 32], strides = [1, 1]} : vector<16x128xf32> to vector<16x32xf32>
    %cst_30 = arith.constant dense<0.000000e+00> : vector<16x32xf32>
    %118 = tpu.matmul %116, %117, %cst_30 {dimension_numbers = #tpu.dot_dimension_numbers<[1], [0], [0], [1], [0, 0, 1, 1], [], []>} : vector<16x16xf32>, vector<16x32xf32>, vector<16x32xf32> -> vector<16x32xf32>
    %119 = arith.addf %114, %118 : vector<16x32xf32>
    %120 = arith.addf %9, %119 : vector<16x32xf32>
    %121 = vector.extract_strided_slice %22 {offsets = [5, 0], sizes = [1, 32], strides = [1, 1]} : vector<20x128xf32> to vector<1x32xf32>
    %122 = vector.shape_cast %121 : vector<1x32xf32> to vector<32xf32>
    %123 = vector.shape_cast %122 : vector<32xf32> to vector<1x32xf32>
    %124 = vector.broadcast %123 : vector<1x32xf32> to vector<16x32xf32>
    %125 = arith.addf %120, %124 : vector<16x32xf32>
    %126 = vector.extract_strided_slice %22 {offsets = [2, 0], sizes = [1, 32], strides = [1, 1]} : vector<20x128xf32> to vector<1x32xf32>
    %127 = vector.shape_cast %126 : vector<1x32xf32> to vector<32xf32>
    %128 = vector.extract_strided_slice %22 {offsets = [3, 0], sizes = [1, 32], strides = [1, 1]} : vector<20x128xf32> to vector<1x32xf32>
    %129 = vector.shape_cast %128 : vector<1x32xf32> to vector<32xf32>
    %cst_31 = arith.constant dense<0.000000e+00> : vector<16xf32>
    %130 = vector.multi_reduction <add>, %125, %cst_31 [1] : vector<16x32xf32> to vector<16xf32>
    %131 = vector.shape_cast %130 : vector<16xf32> to vector<16x1xf32>
    %cst_32 = arith.constant 3.200000e+01 : f32
    %132 = vector.broadcast %cst_32 : f32 to vector<16x1xf32>
    %133 = arith.divf %131, %132 : vector<16x1xf32>
    %134 = vector.broadcast %133 : vector<16x1xf32> to vector<16x32xf32>
    %135 = arith.subf %125, %134 : vector<16x32xf32>
    %136 = arith.mulf %135, %135 : vector<16x32xf32>
    %cst_33 = arith.constant dense<0.000000e+00> : vector<16xf32>
    %137 = vector.multi_reduction <add>, %136, %cst_33 [1] : vector<16x32xf32> to vector<16xf32>
    %138 = vector.shape_cast %137 : vector<16xf32> to vector<16x1xf32>
    %cst_34 = arith.constant 3.200000e+01 : f32
    %139 = vector.broadcast %cst_34 : f32 to vector<16x1xf32>
    %140 = arith.divf %138, %139 : vector<16x1xf32>
    %141 = vector.broadcast %133 : vector<16x1xf32> to vector<16x32xf32>
    %142 = arith.subf %125, %141 : vector<16x32xf32>
    %cst_35 = arith.constant 9.99999974E-6 : f32
    %143 = vector.broadcast %cst_35 : f32 to vector<16x1xf32>
    %144 = arith.addf %140, %143 : vector<16x1xf32>
    %145 = math.rsqrt %144 : vector<16x1xf32>
    %146 = vector.broadcast %145 : vector<16x1xf32> to vector<16x32xf32>
    %147 = arith.mulf %142, %146 : vector<16x32xf32>
    %148 = vector.shape_cast %127 : vector<32xf32> to vector<1x32xf32>
    %149 = vector.broadcast %148 : vector<1x32xf32> to vector<16x32xf32>
    %150 = arith.mulf %147, %149 : vector<16x32xf32>
    %151 = vector.shape_cast %129 : vector<32xf32> to vector<1x32xf32>
    %152 = vector.broadcast %151 : vector<1x32xf32> to vector<16x32xf32>
    %153 = arith.addf %150, %152 : vector<16x32xf32>
    %c0_36 = arith.constant 0 : index
    %c0_37 = arith.constant 0 : index
    %c0_38 = arith.constant 0 : index
    %154 = vector.load %arg7[%c0_36, %c0_37, %c0_38] : memref<2x32x128xf32, #tpu.memory_space<vmem>>, vector<1x32x128xf32>
    %155 = vector.shape_cast %154 : vector<1x32x128xf32> to vector<32x128xf32>
    %cst_39 = arith.constant dense<0.000000e+00> : vector<16x128xf32>
    %156 = tpu.matmul %153, %155, %cst_39 {dimension_numbers = #tpu.dot_dimension_numbers<[1], [0], [0], [1], [0, 0, 1, 1], [], []>} : vector<16x32xf32>, vector<32x128xf32>, vector<16x128xf32> -> vector<16x128xf32>
    %157 = vector.extract_strided_slice %22 {offsets = [6, 0], sizes = [1, 128], strides = [1, 1]} : vector<20x128xf32> to vector<1x128xf32>
    %158 = vector.shape_cast %157 : vector<1x128xf32> to vector<128xf32>
    %159 = vector.shape_cast %158 : vector<128xf32> to vector<1x128xf32>
    %160 = vector.broadcast %159 : vector<1x128xf32> to vector<16x128xf32>
    %161 = arith.addf %156, %160 : vector<16x128xf32>
    %cst_40 = arith.constant 5.000000e-01 : f32
    %162 = vector.broadcast %cst_40 : f32 to vector<16x128xf32>
    %163 = arith.mulf %162, %161 : vector<16x128xf32>
    %cst_41 = arith.constant 4.471500e-02 : f32
    %164 = vector.broadcast %cst_41 : f32 to vector<16x128xf32>
    %165 = arith.mulf %164, %161 : vector<16x128xf32>
    %166 = arith.mulf %165, %161 : vector<16x128xf32>
    %167 = arith.mulf %166, %161 : vector<16x128xf32>
    %168 = arith.addf %161, %167 : vector<16x128xf32>
    %cst_42 = arith.constant 0.797884583 : f32
    %169 = vector.broadcast %cst_42 : f32 to vector<16x128xf32>
    %170 = arith.mulf %169, %168 : vector<16x128xf32>
    %171 = math.tanh %170 : vector<16x128xf32>
    %cst_43 = arith.constant 1.000000e+00 : f32
    %172 = vector.broadcast %cst_43 : f32 to vector<16x128xf32>
    %173 = arith.addf %172, %171 : vector<16x128xf32>
    %174 = arith.mulf %163, %173 : vector<16x128xf32>
    %c0_44 = arith.constant 0 : index
    %c0_45 = arith.constant 0 : index
    %c0_46 = arith.constant 0 : index
    %175 = vector.load %arg8[%c0_44, %c0_45, %c0_46] : memref<2x128x32xf32, #tpu.memory_space<vmem>>, vector<1x128x32xf32>
    %176 = vector.shape_cast %175 : vector<1x128x32xf32> to vector<128x32xf32>
    %cst_47 = arith.constant dense<0.000000e+00> : vector<16x32xf32>
    %177 = tpu.matmul %174, %176, %cst_47 {dimension_numbers = #tpu.dot_dimension_numbers<[1], [0], [0], [1], [0, 0, 1, 1], [], []>} : vector<16x128xf32>, vector<128x32xf32>, vector<16x32xf32> -> vector<16x32xf32>
    %178 = vector.extract_strided_slice %22 {offsets = [7, 0], sizes = [1, 32], strides = [1, 1]} : vector<20x128xf32> to vector<1x32xf32>
    %179 = vector.shape_cast %178 : vector<1x32xf32> to vector<32xf32>
    %180 = vector.shape_cast %179 : vector<32xf32> to vector<1x32xf32>
    %181 = vector.broadcast %180 : vector<1x32xf32> to vector<16x32xf32>
    %182 = arith.addf %177, %181 : vector<16x32xf32>
    %183 = arith.addf %125, %182 : vector<16x32xf32>
    %184 = vector.extract_strided_slice %22 {offsets = [9, 0], sizes = [1, 32], strides = [1, 1]} : vector<20x128xf32> to vector<1x32xf32>
    %185 = vector.shape_cast %184 : vector<1x32xf32> to vector<32xf32>
    %186 = vector.extract_strided_slice %22 {offsets = [10, 0], sizes = [1, 32], strides = [1, 1]} : vector<20x128xf32> to vector<1x32xf32>
    %187 = vector.shape_cast %186 : vector<1x32xf32> to vector<32xf32>
    %cst_48 = arith.constant dense<0.000000e+00> : vector<16xf32>
    %188 = vector.multi_reduction <add>, %183, %cst_48 [1] : vector<16x32xf32> to vector<16xf32>
    %189 = vector.shape_cast %188 : vector<16xf32> to vector<16x1xf32>
    %cst_49 = arith.constant 3.200000e+01 : f32
    %190 = vector.broadcast %cst_49 : f32 to vector<16x1xf32>
    %191 = arith.divf %189, %190 : vector<16x1xf32>
    %192 = vector.broadcast %191 : vector<16x1xf32> to vector<16x32xf32>
    %193 = arith.subf %183, %192 : vector<16x32xf32>
    %194 = arith.mulf %193, %193 : vector<16x32xf32>
    %cst_50 = arith.constant dense<0.000000e+00> : vector<16xf32>
    %195 = vector.multi_reduction <add>, %194, %cst_50 [1] : vector<16x32xf32> to vector<16xf32>
    %196 = vector.shape_cast %195 : vector<16xf32> to vector<16x1xf32>
    %cst_51 = arith.constant 3.200000e+01 : f32
    %197 = vector.broadcast %cst_51 : f32 to vector<16x1xf32>
    %198 = arith.divf %196, %197 : vector<16x1xf32>
    %199 = vector.broadcast %191 : vector<16x1xf32> to vector<16x32xf32>
    %200 = arith.subf %183, %199 : vector<16x32xf32>
    %cst_52 = arith.constant 9.99999974E-6 : f32
    %201 = vector.broadcast %cst_52 : f32 to vector<16x1xf32>
    %202 = arith.addf %198, %201 : vector<16x1xf32>
    %203 = math.rsqrt %202 : vector<16x1xf32>
    %204 = vector.broadcast %203 : vector<16x1xf32> to vector<16x32xf32>
    %205 = arith.mulf %200, %204 : vector<16x32xf32>
    %206 = vector.shape_cast %185 : vector<32xf32> to vector<1x32xf32>
    %207 = vector.broadcast %206 : vector<1x32xf32> to vector<16x32xf32>
    %208 = arith.mulf %205, %207 : vector<16x32xf32>
    %209 = vector.shape_cast %187 : vector<32xf32> to vector<1x32xf32>
    %210 = vector.broadcast %209 : vector<1x32xf32> to vector<16x32xf32>
    %211 = arith.addf %208, %210 : vector<16x32xf32>
    %c1 = arith.constant 1 : index
    %c0_53 = arith.constant 0 : index
    %c0_54 = arith.constant 0 : index
    %212 = vector.load %arg5[%c1, %c0_53, %c0_54] : memref<2x32x64xf32, #tpu.memory_space<vmem>>, vector<1x32x64xf32>
    %213 = vector.shape_cast %212 : vector<1x32x64xf32> to vector<32x64xf32>
    %cst_55 = arith.constant dense<0.000000e+00> : vector<16x64xf32>
    %214 = tpu.matmul %211, %213, %cst_55 {dimension_numbers = #tpu.dot_dimension_numbers<[1], [0], [0], [1], [0, 0, 1, 1], [], []>} : vector<16x32xf32>, vector<32x64xf32>, vector<16x64xf32> -> vector<16x64xf32>
    %215 = vector.extract_strided_slice %22 {offsets = [13, 0], sizes = [1, 64], strides = [1, 1]} : vector<20x128xf32> to vector<1x64xf32>
    %216 = vector.shape_cast %215 : vector<1x64xf32> to vector<64xf32>
    %217 = vector.shape_cast %216 : vector<64xf32> to vector<1x64xf32>
    %218 = vector.broadcast %217 : vector<1x64xf32> to vector<16x64xf32>
    %219 = arith.addf %214, %218 : vector<16x64xf32>
    %c1_56 = arith.constant 1 : index
    %c0_57 = arith.constant 0 : index
    %c0_58 = arith.constant 0 : index
    %220 = vector.load %arg6[%c1_56, %c0_57, %c0_58] : memref<2x32x128xf32, #tpu.memory_space<vmem>>, vector<1x32x128xf32>
    %221 = vector.shape_cast %220 : vector<1x32x128xf32> to vector<32x128xf32>
    %cst_59 = arith.constant dense<0.000000e+00> : vector<16x128xf32>
    %222 = tpu.matmul %211, %221, %cst_59 {dimension_numbers = #tpu.dot_dimension_numbers<[1], [0], [0], [1], [0, 0, 1, 1], [], []>} : vector<16x32xf32>, vector<32x128xf32>, vector<16x128xf32> -> vector<16x128xf32>
    %223 = vector.extract_strided_slice %22 {offsets = [17, 0], sizes = [1, 128], strides = [1, 1]} : vector<20x128xf32> to vector<1x128xf32>
    %224 = vector.shape_cast %223 : vector<1x128xf32> to vector<128xf32>
    %225 = vector.shape_cast %224 : vector<128xf32> to vector<1x128xf32>
    %226 = vector.broadcast %225 : vector<1x128xf32> to vector<16x128xf32>
    %227 = arith.addf %222, %226 : vector<16x128xf32>
    %228 = vector.extract_strided_slice %219 {offsets = [0, 0], sizes = [16, 8], strides = [1, 1]} : vector<16x64xf32> to vector<16x8xf32>
    %229 = vector.extract_strided_slice %219 {offsets = [0, 8], sizes = [16, 8], strides = [1, 1]} : vector<16x64xf32> to vector<16x8xf32>
    %230 = vector.extract_strided_slice %219 {offsets = [0, 16], sizes = [16, 8], strides = [1, 1]} : vector<16x64xf32> to vector<16x8xf32>
    %231 = vector.extract_strided_slice %219 {offsets = [0, 24], sizes = [16, 8], strides = [1, 1]} : vector<16x64xf32> to vector<16x8xf32>
    %232 = vector.shape_cast %228 : vector<16x8xf32> to vector<1x16x8xf32>
    %233 = vector.shape_cast %229 : vector<16x8xf32> to vector<1x16x8xf32>
    %234 = vector.shape_cast %230 : vector<16x8xf32> to vector<1x16x8xf32>
    %235 = vector.shape_cast %231 : vector<16x8xf32> to vector<1x16x8xf32>
    %236 = tpu.concatenate %232, %233, %234, %235 in 0 : vector<1x16x8xf32>, vector<1x16x8xf32>, vector<1x16x8xf32>, vector<1x16x8xf32> -> vector<4x16x8xf32>
    %237 = vector.extract_strided_slice %219 {offsets = [0, 32], sizes = [16, 8], strides = [1, 1]} : vector<16x64xf32> to vector<16x8xf32>
    %238 = vector.extract_strided_slice %219 {offsets = [0, 40], sizes = [16, 8], strides = [1, 1]} : vector<16x64xf32> to vector<16x8xf32>
    %239 = vector.extract_strided_slice %219 {offsets = [0, 48], sizes = [16, 8], strides = [1, 1]} : vector<16x64xf32> to vector<16x8xf32>
    %240 = vector.extract_strided_slice %219 {offsets = [0, 56], sizes = [16, 8], strides = [1, 1]} : vector<16x64xf32> to vector<16x8xf32>
    %241 = vector.shape_cast %237 : vector<16x8xf32> to vector<1x16x8xf32>
    %242 = vector.shape_cast %238 : vector<16x8xf32> to vector<1x16x8xf32>
    %243 = vector.shape_cast %239 : vector<16x8xf32> to vector<1x16x8xf32>
    %244 = vector.shape_cast %240 : vector<16x8xf32> to vector<1x16x8xf32>
    %245 = tpu.concatenate %241, %242, %243, %244 in 0 : vector<1x16x8xf32>, vector<1x16x8xf32>, vector<1x16x8xf32>, vector<1x16x8xf32> -> vector<4x16x8xf32>
    "tpu.trace_start"() <{level = 10 : i32, message = "hqd,hkd->hqk"}> : () -> ()
    %cst_60 = arith.constant dense<0.000000e+00> : vector<4x16x16xf32>
    %246 = tpu.matmul %236, %245, %cst_60 {dimension_numbers = #tpu.dot_dimension_numbers<[2], [2], [1], [1], [0, 0, 0, 1, 1, 1], [0], [0]>} : vector<4x16x8xf32>, vector<4x16x8xf32>, vector<4x16x16xf32> -> vector<4x16x16xf32>
    "tpu.trace_stop"() : () -> ()
    %247 = vector.shape_cast %21 : vector<16x16xf32> to vector<1x16x16xf32>
    %248 = vector.broadcast %247 : vector<1x16x16xf32> to vector<4x16x16xf32>
    %249 = arith.addf %246, %248 : vector<4x16x16xf32>
    %cst_61 = arith.constant dense<0xFF800000> : vector<4x16xf32>
    %250 = vector.multi_reduction <maximumf>, %249, %cst_61 [2] : vector<4x16x16xf32> to vector<4x16xf32>
    %251 = vector.shape_cast %250 : vector<4x16xf32> to vector<4x16x1xf32>
    %252 = vector.broadcast %251 : vector<4x16x1xf32> to vector<4x16x16xf32>
    %253 = arith.subf %249, %252 : vector<4x16x16xf32>
    %254 = math.exp %253 : vector<4x16x16xf32>
    %cst_62 = arith.constant dense<0.000000e+00> : vector<4x16xf32>
    %255 = vector.multi_reduction <add>, %254, %cst_62 [2] : vector<4x16x16xf32> to vector<4x16xf32>
    %256 = vector.shape_cast %255 : vector<4x16xf32> to vector<4x16x1xf32>
    %257 = tpu.reciprocal %256 {approx = true} : vector<4x16x1xf32> -> vector<4x16x1xf32>
    %258 = vector.broadcast %257 : vector<4x16x1xf32> to vector<4x16x16xf32>
    %259 = arith.mulf %254, %258 : vector<4x16x16xf32>
    %cst_63 = arith.constant 0.000000e+00 : f32
    %260 = vector.broadcast %cst_63 : f32 to vector<16x32xf32>
    %261 = vector.extract_strided_slice %259 {offsets = [0, 0, 0], sizes = [1, 16, 16], strides = [1, 1, 1]} : vector<4x16x16xf32> to vector<1x16x16xf32>
    %262 = vector.shape_cast %261 : vector<1x16x16xf32> to vector<16x16xf32>
    %263 = vector.extract_strided_slice %227 {offsets = [0, 0], sizes = [16, 32], strides = [1, 1]} : vector<16x128xf32> to vector<16x32xf32>
    %cst_64 = arith.constant dense<0.000000e+00> : vector<16x32xf32>
    %264 = tpu.matmul %262, %263, %cst_64 {dimension_numbers = #tpu.dot_dimension_numbers<[1], [0], [0], [1], [0, 0, 1, 1], [], []>} : vector<16x16xf32>, vector<16x32xf32>, vector<16x32xf32> -> vector<16x32xf32>
    %265 = arith.addf %260, %264 : vector<16x32xf32>
    %266 = vector.extract_strided_slice %259 {offsets = [1, 0, 0], sizes = [1, 16, 16], strides = [1, 1, 1]} : vector<4x16x16xf32> to vector<1x16x16xf32>
    %267 = vector.shape_cast %266 : vector<1x16x16xf32> to vector<16x16xf32>
    %268 = vector.extract_strided_slice %227 {offsets = [0, 32], sizes = [16, 32], strides = [1, 1]} : vector<16x128xf32> to vector<16x32xf32>
    %cst_65 = arith.constant dense<0.000000e+00> : vector<16x32xf32>
    %269 = tpu.matmul %267, %268, %cst_65 {dimension_numbers = #tpu.dot_dimension_numbers<[1], [0], [0], [1], [0, 0, 1, 1], [], []>} : vector<16x16xf32>, vector<16x32xf32>, vector<16x32xf32> -> vector<16x32xf32>
    %270 = arith.addf %265, %269 : vector<16x32xf32>
    %271 = vector.extract_strided_slice %259 {offsets = [2, 0, 0], sizes = [1, 16, 16], strides = [1, 1, 1]} : vector<4x16x16xf32> to vector<1x16x16xf32>
    %272 = vector.shape_cast %271 : vector<1x16x16xf32> to vector<16x16xf32>
    %273 = vector.extract_strided_slice %227 {offsets = [0, 64], sizes = [16, 32], strides = [1, 1]} : vector<16x128xf32> to vector<16x32xf32>
    %cst_66 = arith.constant dense<0.000000e+00> : vector<16x32xf32>
    %274 = tpu.matmul %272, %273, %cst_66 {dimension_numbers = #tpu.dot_dimension_numbers<[1], [0], [0], [1], [0, 0, 1, 1], [], []>} : vector<16x16xf32>, vector<16x32xf32>, vector<16x32xf32> -> vector<16x32xf32>
    %275 = arith.addf %270, %274 : vector<16x32xf32>
    %276 = vector.extract_strided_slice %259 {offsets = [3, 0, 0], sizes = [1, 16, 16], strides = [1, 1, 1]} : vector<4x16x16xf32> to vector<1x16x16xf32>
    %277 = vector.shape_cast %276 : vector<1x16x16xf32> to vector<16x16xf32>
    %278 = vector.extract_strided_slice %227 {offsets = [0, 96], sizes = [16, 32], strides = [1, 1]} : vector<16x128xf32> to vector<16x32xf32>
    %cst_67 = arith.constant dense<0.000000e+00> : vector<16x32xf32>
    %279 = tpu.matmul %277, %278, %cst_67 {dimension_numbers = #tpu.dot_dimension_numbers<[1], [0], [0], [1], [0, 0, 1, 1], [], []>} : vector<16x16xf32>, vector<16x32xf32>, vector<16x32xf32> -> vector<16x32xf32>
    %280 = arith.addf %275, %279 : vector<16x32xf32>
    %281 = arith.addf %183, %280 : vector<16x32xf32>
    %282 = vector.extract_strided_slice %22 {offsets = [14, 0], sizes = [1, 32], strides = [1, 1]} : vector<20x128xf32> to vector<1x32xf32>
    %283 = vector.shape_cast %282 : vector<1x32xf32> to vector<32xf32>
    %284 = vector.shape_cast %283 : vector<32xf32> to vector<1x32xf32>
    %285 = vector.broadcast %284 : vector<1x32xf32> to vector<16x32xf32>
    %286 = arith.addf %281, %285 : vector<16x32xf32>
    %287 = vector.extract_strided_slice %22 {offsets = [11, 0], sizes = [1, 32], strides = [1, 1]} : vector<20x128xf32> to vector<1x32xf32>
    %288 = vector.shape_cast %287 : vector<1x32xf32> to vector<32xf32>
    %289 = vector.extract_strided_slice %22 {offsets = [12, 0], sizes = [1, 32], strides = [1, 1]} : vector<20x128xf32> to vector<1x32xf32>
    %290 = vector.shape_cast %289 : vector<1x32xf32> to vector<32xf32>
    %cst_68 = arith.constant dense<0.000000e+00> : vector<16xf32>
    %291 = vector.multi_reduction <add>, %286, %cst_68 [1] : vector<16x32xf32> to vector<16xf32>
    %292 = vector.shape_cast %291 : vector<16xf32> to vector<16x1xf32>
    %cst_69 = arith.constant 3.200000e+01 : f32
    %293 = vector.broadcast %cst_69 : f32 to vector<16x1xf32>
    %294 = arith.divf %292, %293 : vector<16x1xf32>
    %295 = vector.broadcast %294 : vector<16x1xf32> to vector<16x32xf32>
    %296 = arith.subf %286, %295 : vector<16x32xf32>
    %297 = arith.mulf %296, %296 : vector<16x32xf32>
    %cst_70 = arith.constant dense<0.000000e+00> : vector<16xf32>
    %298 = vector.multi_reduction <add>, %297, %cst_70 [1] : vector<16x32xf32> to vector<16xf32>
    %299 = vector.shape_cast %298 : vector<16xf32> to vector<16x1xf32>
    %cst_71 = arith.constant 3.200000e+01 : f32
    %300 = vector.broadcast %cst_71 : f32 to vector<16x1xf32>
    %301 = arith.divf %299, %300 : vector<16x1xf32>
    %302 = vector.broadcast %294 : vector<16x1xf32> to vector<16x32xf32>
    %303 = arith.subf %286, %302 : vector<16x32xf32>
    %cst_72 = arith.constant 9.99999974E-6 : f32
    %304 = vector.broadcast %cst_72 : f32 to vector<16x1xf32>
    %305 = arith.addf %301, %304 : vector<16x1xf32>
    %306 = math.rsqrt %305 : vector<16x1xf32>
    %307 = vector.broadcast %306 : vector<16x1xf32> to vector<16x32xf32>
    %308 = arith.mulf %303, %307 : vector<16x32xf32>
    %309 = vector.shape_cast %288 : vector<32xf32> to vector<1x32xf32>
    %310 = vector.broadcast %309 : vector<1x32xf32> to vector<16x32xf32>
    %311 = arith.mulf %308, %310 : vector<16x32xf32>
    %312 = vector.shape_cast %290 : vector<32xf32> to vector<1x32xf32>
    %313 = vector.broadcast %312 : vector<1x32xf32> to vector<16x32xf32>
    %314 = arith.addf %311, %313 : vector<16x32xf32>
    %c1_73 = arith.constant 1 : index
    %c0_74 = arith.constant 0 : index
    %c0_75 = arith.constant 0 : index
    %315 = vector.load %arg7[%c1_73, %c0_74, %c0_75] : memref<2x32x128xf32, #tpu.memory_space<vmem>>, vector<1x32x128xf32>
    %316 = vector.shape_cast %315 : vector<1x32x128xf32> to vector<32x128xf32>
    %cst_76 = arith.constant dense<0.000000e+00> : vector<16x128xf32>
    %317 = tpu.matmul %314, %316, %cst_76 {dimension_numbers = #tpu.dot_dimension_numbers<[1], [0], [0], [1], [0, 0, 1, 1], [], []>} : vector<16x32xf32>, vector<32x128xf32>, vector<16x128xf32> -> vector<16x128xf32>
    %318 = vector.extract_strided_slice %22 {offsets = [15, 0], sizes = [1, 128], strides = [1, 1]} : vector<20x128xf32> to vector<1x128xf32>
    %319 = vector.shape_cast %318 : vector<1x128xf32> to vector<128xf32>
    %320 = vector.shape_cast %319 : vector<128xf32> to vector<1x128xf32>
    %321 = vector.broadcast %320 : vector<1x128xf32> to vector<16x128xf32>
    %322 = arith.addf %317, %321 : vector<16x128xf32>
    %cst_77 = arith.constant 5.000000e-01 : f32
    %323 = vector.broadcast %cst_77 : f32 to vector<16x128xf32>
    %324 = arith.mulf %323, %322 : vector<16x128xf32>
    %cst_78 = arith.constant 4.471500e-02 : f32
    %325 = vector.broadcast %cst_78 : f32 to vector<16x128xf32>
    %326 = arith.mulf %325, %322 : vector<16x128xf32>
    %327 = arith.mulf %326, %322 : vector<16x128xf32>
    %328 = arith.mulf %327, %322 : vector<16x128xf32>
    %329 = arith.addf %322, %328 : vector<16x128xf32>
    %cst_79 = arith.constant 0.797884583 : f32
    %330 = vector.broadcast %cst_79 : f32 to vector<16x128xf32>
    %331 = arith.mulf %330, %329 : vector<16x128xf32>
    %332 = math.tanh %331 : vector<16x128xf32>
    %cst_80 = arith.constant 1.000000e+00 : f32
    %333 = vector.broadcast %cst_80 : f32 to vector<16x128xf32>
    %334 = arith.addf %333, %332 : vector<16x128xf32>
    %335 = arith.mulf %324, %334 : vector<16x128xf32>
    %c1_81 = arith.constant 1 : index
    %c0_82 = arith.constant 0 : index
    %c0_83 = arith.constant 0 : index
    %336 = vector.load %arg8[%c1_81, %c0_82, %c0_83] : memref<2x128x32xf32, #tpu.memory_space<vmem>>, vector<1x128x32xf32>
    %337 = vector.shape_cast %336 : vector<1x128x32xf32> to vector<128x32xf32>
    %cst_84 = arith.constant dense<0.000000e+00> : vector<16x32xf32>
    %338 = tpu.matmul %335, %337, %cst_84 {dimension_numbers = #tpu.dot_dimension_numbers<[1], [0], [0], [1], [0, 0, 1, 1], [], []>} : vector<16x128xf32>, vector<128x32xf32>, vector<16x32xf32> -> vector<16x32xf32>
    %339 = vector.extract_strided_slice %22 {offsets = [16, 0], sizes = [1, 32], strides = [1, 1]} : vector<20x128xf32> to vector<1x32xf32>
    %340 = vector.shape_cast %339 : vector<1x32xf32> to vector<32xf32>
    %341 = vector.shape_cast %340 : vector<32xf32> to vector<1x32xf32>
    %342 = vector.broadcast %341 : vector<1x32xf32> to vector<16x32xf32>
    %343 = arith.addf %338, %342 : vector<16x32xf32>
    %344 = arith.addf %286, %343 : vector<16x32xf32>
    %345 = vector.extract_strided_slice %22 {offsets = [18, 0], sizes = [1, 32], strides = [1, 1]} : vector<20x128xf32> to vector<1x32xf32>
    %346 = vector.shape_cast %345 : vector<1x32xf32> to vector<32xf32>
    %347 = vector.extract_strided_slice %22 {offsets = [19, 0], sizes = [1, 32], strides = [1, 1]} : vector<20x128xf32> to vector<1x32xf32>
    %348 = vector.shape_cast %347 : vector<1x32xf32> to vector<32xf32>
    %cst_85 = arith.constant dense<0.000000e+00> : vector<16xf32>
    %349 = vector.multi_reduction <add>, %344, %cst_85 [1] : vector<16x32xf32> to vector<16xf32>
    %350 = vector.shape_cast %349 : vector<16xf32> to vector<16x1xf32>
    %cst_86 = arith.constant 3.200000e+01 : f32
    %351 = vector.broadcast %cst_86 : f32 to vector<16x1xf32>
    %352 = arith.divf %350, %351 : vector<16x1xf32>
    %353 = vector.broadcast %352 : vector<16x1xf32> to vector<16x32xf32>
    %354 = arith.subf %344, %353 : vector<16x32xf32>
    %355 = arith.mulf %354, %354 : vector<16x32xf32>
    %cst_87 = arith.constant dense<0.000000e+00> : vector<16xf32>
    %356 = vector.multi_reduction <add>, %355, %cst_87 [1] : vector<16x32xf32> to vector<16xf32>
    %357 = vector.shape_cast %356 : vector<16xf32> to vector<16x1xf32>
    %cst_88 = arith.constant 3.200000e+01 : f32
    %358 = vector.broadcast %cst_88 : f32 to vector<16x1xf32>
    %359 = arith.divf %357, %358 : vector<16x1xf32>
    %360 = vector.broadcast %352 : vector<16x1xf32> to vector<16x32xf32>
    %361 = arith.subf %344, %360 : vector<16x32xf32>
    %cst_89 = arith.constant 9.99999974E-6 : f32
    %362 = vector.broadcast %cst_89 : f32 to vector<16x1xf32>
    %363 = arith.addf %359, %362 : vector<16x1xf32>
    %364 = math.rsqrt %363 : vector<16x1xf32>
    %365 = vector.broadcast %364 : vector<16x1xf32> to vector<16x32xf32>
    %366 = arith.mulf %361, %365 : vector<16x32xf32>
    %367 = vector.shape_cast %346 : vector<32xf32> to vector<1x32xf32>
    %368 = vector.broadcast %367 : vector<1x32xf32> to vector<16x32xf32>
    %369 = arith.mulf %366, %368 : vector<16x32xf32>
    %370 = vector.shape_cast %348 : vector<32xf32> to vector<1x32xf32>
    %371 = vector.broadcast %370 : vector<1x32xf32> to vector<16x32xf32>
    %372 = arith.addf %369, %371 : vector<16x32xf32>
    %c0_90 = arith.constant 0 : index
    %c0_91 = arith.constant 0 : index
    %373 = vector.load %arg2[%c0_90, %c0_91] : memref<32x128xf32, #tpu.memory_space<vmem>>, vector<32x128xf32>
    %cst_92 = arith.constant dense<0.000000e+00> : vector<16x128xf32>
    %374 = tpu.matmul %372, %373, %cst_92 {dimension_numbers = #tpu.dot_dimension_numbers<[1], [0], [0], [1], [0, 0, 1, 1], [], []>} : vector<16x32xf32>, vector<32x128xf32>, vector<16x128xf32> -> vector<16x128xf32>
    %c0_93 = arith.constant 0 : index
    %c0_94 = arith.constant 0 : index
    %375 = vector.load %arg9[%c0_93, %c0_94] : memref<16x128xf32, #tpu.memory_space<vmem>>, vector<16x128xf32>
    tpu.vector_store %arg9[%c0_93, %c0_94], %374 {strides = array<i32>} : memref<16x128xf32, #tpu.memory_space<vmem>>, vector<16x128xf32>,
    return
  }
}

</mosaic_0001>

<bundles_post_ra>
// kernel: tpu_custom_call.1
= control target key start
LH: loop header
LB: loop body
LE: loop exit
PB: predicated region body
PF: predicated region fallthrough
CT: control target
= control target key end

     0   :  { %v1771_v2 = vmov 0   ;;  %s2386_s0 = inlined_call_operand.vmem [shape: s32[16,1], index: 0, kind: input, shape index: {}]   ;;  %s2387_s1 = inlined_call_operand.vmem [shape: f32[128,32], index: 1, kind: input, shape index: {}]   ;;  %s2388_s2 = inlined_call_operand.vmem [shape: f32[32,128], index: 2, kind: input, shape index: {}]   ;;  %s2389_s3 = inlined_call_operand.vmem [shape: f32[16,32], index: 3, kind: input, shape index: {}]   ;;  %s2390_s4 = inlined_call_operand.vmem [shape: f32[20,128], index: 4, kind: input, shape index: {}]   ;;  %s2391_s5 = inlined_call_operand.vmem [shape: f32[2,32,64], index: 5, kind: input, shape index: {}]   ;;  %s2392_s6 = inlined_call_operand.vmem [shape: f32[2,32,128], index: 6, kind: input, shape index: {}]   ;;  %s2393_s7 = inlined_call_operand.vmem [shape: f32[2,32,128], index: 7, kind: input, shape index: {}]   ;;  %s2394_s8 = inlined_call_operand.vmem [shape: f32[2,128,32], index: 8, kind: input, shape index: {}]   ;;  %s2395_s9 = inlined_call_operand.hbm [shape: f32[16,128], index: 9, kind: output, shape index: {}]  }
   0x1   :  { %v33_v0 = vld [vmem:[%s2386_s0] sm:$0xff]  ;;  %v64_v1 = vld [vmem:[%s2387_s1 + $0x78] sm:$0xff]  ;;  %1619 = vset.pattern.permute.xlu0 %v1771_v2  ;;  %v63_v3 = vld [vmem:[%s2387_s1 + $0x70] sm:$0xff] }
   0x2   :  { %67 = vmatpush.msra.mxu0 %v64_v1  ;;  %38 = vperm.xlu0 %1619, %v33_v0   ;;  %v62_v4 = vld [vmem:[%s2387_s1 + $0x68] sm:$0xff]  ;;  %v61_v5 = vld [vmem:[%s2387_s1 + $0x60] sm:$0xff] }
   0x4   :  { %68 = vmatpush.msra.mxu0 %v63_v3 }
   0x6   :  { %69 = vmatpush.msra.mxu0 %v62_v4 }
   0x7   :  { %14 = vsyncpa [#allocation3], 0  ;;  %v60_v6 = vld [vmem:[%s2387_s1 + $0x58] sm:$0xff]  ;;  %v34_v7 = vld [vmem:[%s2386_s0 + $0x8] sm:$0xff]  ;;  %v35_v19 = vlaneseq  ;;  %v1772_v22 = vmov 1.0   ;;  %vm107_vm2 = vcmask 261120  }
   0x8   :  { %70 = vmatpush.msra.mxu0 %v61_v5  ;;  %v59_v8 = vld [vmem:[%s2387_s1 + $0x50] sm:$0xff]  ;;  %v58_v9 = vld [vmem:[%s2387_s1 + $0x48] sm:$0xff]  ;;  %v57_v10 = vld [vmem:[%s2387_s1 + $0x40] sm:$0xff]  ;;  %v1773_v32 = vmov 32.0   ;;  %s1774_s21 = smov 112   ;;  %s1775_s22 = smov 104  }
   0x9   :  { %v56_v11 = vld [vmem:[%s2387_s1 + $0x38] sm:$0xff]  ;;  %v55_v12 = vld [vmem:[%s2387_s1 + $0x30] sm:$0xff]  ;;  %v54_v13 = vld [vmem:[%s2387_s1 + $0x28] sm:$0xff]  ;;  %v1889_v20 = vand.u32 127, %v35_v19  ;;  %1650 = vrcp.f32 %v1773_v32  ;;  %s1776_s23 = smov 96   ;;  %s1777_s24 = smov 120  }
   0xa   :  { %71 = vmatpush.msra.mxu0 %v60_v6  ;;  %41 = vperm.xlu0 %1619, %v34_v7   ;;  %v53_v14 = vld [vmem:[%s2387_s1 + $0x20] sm:$0xff]  ;;  %v52_v15 = vld [vmem:[%s2387_s1 + $0x18] sm:$0xff]  ;;  %v51_v16 = vld [vmem:[%s2387_s1 + $0x10] sm:$0xff]  ;;  %vm245_vm10 = vcmask 64512   ;;  %s1780_s26 = smov 32   ;;  %s1498_s27 = sshll.u32 %s2395_s9, 4  ;;  %s1499_s27 = int_to_ptr.hbm [resolvable:$true] %s1498_s27 }
   0xb   :  { %v50_v17 = vld [vmem:[%s2387_s1 + $0x8] sm:$0xff]  ;;  %v49_v18 = vld [vmem:[%s2387_s1] sm:$0xff]  ;;  %v168_v49 = vld [vmem:[%s2391_s5 + $0x18] sm:$0xff]  ;;  %s1782_s28 = smov 128  }
   0xc   :  { %72 = vmatpush.msra.mxu0 %v59_v8  ;;  %v65_v24 = vld [vmem:[%s2389_s3] sm:$0xff]  ;;  %v66_v28 = vld [vmem:[%s2389_s3 + $0x8] sm:$0xff]  ;;  %v202_v50 = vld [vmem:[%s2392_s6 + $0x18] sm:$0xff]  ;;  %188 = vmatpush.msra.mxu1 %v168_v49  ;;  %s1779_s3 = smov 64  }
   0xd   :  { %216 = vmatpush.msra.mxu2 %v202_v50  ;;  %v167_v51 = vld [vmem:[%s2391_s5 + $0x10] sm:$0xff]  ;;  %v166_v53 = vld [vmem:[%s2391_s5 + $0x8] sm:$0xff]  ;;  %v165_v55 = vld [vmem:[%s2391_s5] sm:$0xff] }
   0xe   :  { %73 = vmatpush.msra.mxu0 %v58_v9  ;;  %v201_v52 = vld [vmem:[%s2392_s6 + $0x10] sm:$0xff]  ;;  %189 = vmatpush.msra.mxu1 %v167_v51  ;;  %v200_v54 = vld [vmem:[%s2392_s6 + $0x8] sm:$0xff]  ;;  %v199_v56 = vld [vmem:[%s2392_s6] sm:$0xff] }
   0xf   :  { %v1651_v33 = vpop.eup %1650  ;;  %217 = vmatpush.msra.mxu2 %v201_v52  ;;  %v1944_v4 = vld [vmem:[%s2390_s4] sm:$0xff]  ;;  %v91_v52 = vshrl.u32 %v35_v19, 7 }
  0x10   :  { %74 = vmatpush.msra.mxu0 %v57_v10  ;;  %v115_v34 = vmul.f32 32.0, %v1651_v33  ;;  %vm119_vm3 = vweird.f32 %v1651_v33  ;;  %190 = vmatpush.msra.mxu1 %v166_v53  ;;  %v159_v8 = vperm.slane %v1944_v4, 0 }
  0x11   :  { %218 = vmatpush.msra.mxu2 %v200_v54  ;;  %v93_v53 = vshra.s32 %v91_v52, 3  ;;  %v95_v54 = vshra.s32 %v1889_v20, 3  ;;  %vm98_vm12 = vcmp.ge.s32.totalorder %v91_v52, %v1889_v20 }
  0x12   :  { %75 = vmatpush.msra.mxu0 %v56_v11  ;;  %v116_v35 = vsub.f32 1.0, %v115_v34  ;;  %191 = vmatpush.msra.mxu1 %v165_v55  ;;  %v92_v55 = vadd.s32 8, %v91_v52 }
  0x13   :  { %219 = vmatpush.msra.mxu2 %v199_v56  ;;  %vm96_vm11 = vcmp.eq.s32.totalorder %v93_v53, %v95_v54 }
  0x14   :  { %76 = vmatpush.msra.mxu0 %v55_v12  ;;  %v117_v36 = vmul.f32 %v1651_v33, %v116_v35  ;;  %v162_v12 = vperm.slane %v1944_v4, 1  ;;  %v94_v56 = vshra.s32 %v92_v55, 3  ;;  %vm100_vm13 = vmand %vm96_vm11, %vm98_vm12  ;;  %vm99_vm15 = vcmp.ge.s32.totalorder %v92_v55, %v1889_v20 }
  0x16   :  { %77 = vmatpush.msra.mxu0 %v54_v13  ;;  %v118_v37 = vadd.f32 %v1651_v33, %v117_v36  ;;  %vm97_vm14 = vcmp.eq.s32.totalorder %v94_v56, %v95_v54 }
  0x18   :  { %78 = vmatpush.msra.mxu0 %v53_v14  ;;  %v1907_v38 = vsel %vm119_vm3, %v1651_v33, %v118_v37 }
  0x1a   :  { %79 = vmatpush.msra.mxu0 %v52_v15 }
  0x1c   :  { %80 = vmatpush.msra.mxu0 %v51_v16 }
  0x1e   :  { %81 = vmatpush.msra.mxu0 %v50_v17 }
  0x20   :  { %82 = vmatpush.msra.mxu0 %v49_v18 }
  0x74   :  { %v39_v21 = vpop.permute.xlu0 %38 }
  0x75   :  { %vm43_vm0 = vcmp.eq.s32.totalorder %v1889_v20, %v39_v21 }
  0x76   :  { %1512 = vmatmul.msk.f32.vlgmr.msra.gmra.mxu0 %vm43_vm0, %v1772_v22  ;;  %vm382_vm0 = vcmask 130048  }
  0x7c   :  { %v42_v23 = vpop.permute.xlu0 %41 }
  0x7d   :  { %vm44_vm1 = vcmp.eq.s32.totalorder %v1889_v20, %v42_v23 }
  0x7e   :  { %1513 = vmatmul.msk.f32.gmra.mxu0 %vm44_vm1, %v1772_v22  ;;  %vm101_vm1 = vmand %vm97_vm14, %vm99_vm15 }
  0xf3   :  { %v84_v25 = vpop.f32.mrf.mxu0 }
  0xf4   :  { %v1896_v26 = vadd.f32 %v84_v25, %v65_v24  ;;  %v169_v24 = vperm.slane %v1944_v4, 4 }
  0xf6   :  { %v108_v27 = vsel %vm107_vm2, %v1896_v26, 0.0 }
  0xf7   :  { %109 = vadd.xlane.f32.xlu1 %v108_v27 }
  0xfb   :  { %v87_v29 = vpop.f32.mrf.mxu0 }
  0xfc   :  { %v1903_v30 = vadd.f32 %v87_v29, %v66_v28 }
  0xfe   :  { %v111_v31 = vsel %vm107_vm2, %v1903_v30, 0.0 }
  0xff   :  { %112 = vadd.xlane.f32.xlu1 %v111_v31 }
 0x16a   :  { %v110_v39 = vpop.xlane.xlu1 %109 }
 0x16b   :  { %v121_v40 = vmul.f32 %v1907_v38, %v110_v39 }
 0x16d   :  { %v123_v41 = vsub.f32 %v1896_v26, %v121_v40 }
 0x16f   :  { %v125_v42 = vmul.f32 %v123_v41, %v123_v41 }
 0x171   :  { %v127_v43 = vsel %vm107_vm2, %v125_v42, 0.0 }
 0x172   :  { %128 = vadd.xlane.f32.xlu2 %v127_v43  ;;  %v113_v44 = vpop.xlane.xlu1 %112 }
 0x173   :  { %v122_v45 = vmul.f32 %v1907_v38, %v113_v44 }
 0x175   :  { %v124_v46 = vsub.f32 %v1903_v30, %v122_v45 }
 0x177   :  { %v126_v47 = vmul.f32 %v124_v46, %v124_v46 }
 0x179   :  { %v130_v48 = vsel %vm107_vm2, %v126_v47, 0.0 }
 0x17a   :  { %131 = vadd.xlane.f32.xlu2 %v130_v48 }
 0x1e5   :  { %v129_v57 = vpop.xlane.xlu2 %128 }
 0x1e6   :  { %v133_v58 = vmul.f32 %v129_v57, %v1907_v38  ;;  %v1778_v57 = vmov -1e+30  }
 0x1e8   :  { %v135_v59 = vadd.f32 1e-05, %v133_v58  ;;  %v2000_v58 = vsel %vm100_vm13, 0.0, %v1778_v57 }
 0x1ea   :  { %1652 = vrsqrt.f32 %v135_v59  ;;  %vm143_vm5 = vweird.f32 %v135_v59 }
 0x1ed   :  { %v132_v60 = vpop.xlane.xlu2 %131 }
 0x1ee   :  { %v134_v61 = vmul.f32 %v132_v60, %v1907_v38 }
 0x1f0   :  { %v1653_v62 = vpop.eup %1652  ;;  %v136_v63 = vadd.f32 1e-05, %v134_v61  ;;  %v2005_v61 = vsel %vm101_vm1, 0.0, %v1778_v57 }
 0x1f1   :  { %v138_v0 = vmul.f32 %v1653_v62, %v135_v59  ;;  %vm144_vm4 = vweird.f32 %v1653_v62 }
 0x1f2   :  { %1654 = vrsqrt.f32 %v136_v63  ;;  %vm145_vm6 = vmor %vm143_vm5, %vm144_vm4  ;;  %vm153_vm8 = vweird.f32 %v136_v63 }
 0x1f3   :  { %v139_v1 = vmul.f32 %v1653_v62, %v138_v0 }
 0x1f5   :  { %v140_v2 = vmul.f32 0.5, %v139_v1 }
 0x1f7   :  { %v141_v3 = vsub.f32 1.5, %v140_v2 }
 0x1f8   :  { %v1655_v5 = vpop.eup %1654 }
 0x1f9   :  { %v142_v6 = vmul.f32 %v1653_v62, %v141_v3  ;;  %v148_v7 = vmul.f32 %v1655_v5, %v136_v63  ;;  %vm154_vm7 = vweird.f32 %v1655_v5 }
 0x1fa   :  { %vm155_vm9 = vmor %vm153_vm8, %vm154_vm7 }
 0x1fb   :  { %v146_v9 = vsel %vm145_vm6, %v1653_v62, %v142_v6  ;;  %v149_v10 = vmul.f32 %v1655_v5, %v148_v7 }
 0x1fc   :  { %v157_v11 = vmul.f32 %v146_v9, %v123_v41  ;;  %v1976_v41 = vld [vmem:[%s2390_s4 + $0x8] sm:$0xff] }
 0x1fd   :  { %v150_v13 = vmul.f32 0.5, %v149_v10  ;;  %v203_v44 = vperm.slane %v1976_v41, 0 }
 0x1fe   :  { %v160_v14 = vmul.f32 %v159_v8, %v157_v11 }
 0x1ff   :  { %v151_v15 = vsub.f32 1.5, %v150_v13 }
 0x200   :  { %v163_v16 = vadd.f32 %v162_v12, %v160_v14 }
 0x201   :  { %v152_v17 = vmul.f32 %v1655_v5, %v151_v15 }
 0x202   :  { %1514 = vmatmul.msk.f32.vlgmr.msra.gmra.mxu1 %vm107_vm2, %v163_v16  ;;  %1516 = vmatmul.msk.f32.vlgmr.msra.gmra.mxu2 %vm107_vm2, %v163_v16 }
 0x203   :  { %v156_v18 = vsel %vm155_vm9, %v1655_v5, %v152_v17 }
 0x204   :  { %v158_v21 = vmul.f32 %v156_v18, %v124_v46 }
 0x206   :  { %v161_v22 = vmul.f32 %v159_v8, %v158_v21 }
 0x208   :  { %v164_v23 = vadd.f32 %v162_v12, %v161_v22 }
 0x20a   :  { %1515 = vmatmul.msk.f32.gmra.mxu1 %vm107_vm2, %v164_v23  ;;  %1517 = vmatmul.msk.f32.gmra.mxu2 %vm107_vm2, %v164_v23 }
 0x27f   :  { %v193_v25 = vpop.f32.mrf.mxu1 }
 0x280   :  { %v194_v27 = vadd.f32 %v193_v25, %v169_v24 }
 0x282   :  { %233 = vrot.lane.b32.xlu1 %v194_v27, %s1774_s21 }
 0x285   :  { %v221_v40 = vpop.f32.mrf.mxu2 }
 0x286   :  { %v1984_v47 = vadd.f32 %v221_v40, %v203_v44 }
 0x287   :  { %v196_v28 = vpop.f32.mrf.mxu1 }
 0x288   :  { %v197_v29 = vadd.f32 %v196_v28, %v169_v24 }
 0x28a   :  { %239 = vrot.lane.b32.xlu2 %v197_v29, %s1775_s22  ;;  %235 = vrot.lane.b32.xlu0 %v197_v29, %s1774_s21 }
 0x28d   :  { %v224_v43 = vpop.f32.mrf.mxu2 }
 0x28e   :  { %v1980_v45 = vadd.f32 %v224_v43, %v203_v44 }
 0x292   :  { %243 = vrot.lane.b32.xlu2 %v197_v29, %s1776_s23  ;;  %237 = vrot.lane.b32.xlu0 %v194_v27, %s1775_s22 }
 0x29a   :  { %231 = vrot.lane.b32.xlu0 %v197_v29, %s1777_s24 }
 0x2a2   :  { %229 = vrot.lane.b32.xlu0 %v194_v27, %s1777_s24 }
 0x2aa   :  { %241 = vrot.lane.b32.xlu0 %v194_v27, %s1776_s23 }
 0x2e4   :  { %v240_v31 = vpop.permute.xlu2 %239 }
 0x2ec   :  { %v244_v32 = vpop.permute.xlu2 %243 }
 0x2ed   :  { %1518 = vmatpush.xpose.msk.msrb.mxu1 %vm245_vm10, %v244_v32  ;;  %1604 = vmatpush.xpose.msk.msra.mxu3 %vm245_vm10, %v244_v32 }
 0x2f4   :  { %v234_v33 = vpop.permute.xlu1 %233 }
 0x2f5   :  { %312 = vrot.lane.b32.xlu2 %v234_v33, %s1776_s23 }
 0x2fc   :  { %v236_v34 = vpop.permute.xlu0 %235 }
 0x2fd   :  { %314 = vrot.lane.b32.xlu1 %v236_v34, %s1776_s23 }
 0x304   :  { %v238_v35 = vpop.permute.xlu0 %237 }
 0x305   :  { %349 = vrot.lane.b32.xlu1 %v240_v31, %s1776_s23  ;;  %347 = vrot.lane.b32.xlu2 %v238_v35, %s1776_s23 }
 0x30c   :  { %v232_v36 = vpop.permute.xlu0 %231 }
 0x30d   :  { %279 = vrot.lane.b32.xlu0 %v232_v36, %s1776_s23 }
 0x314   :  { %v230_v37 = vpop.permute.xlu0 %229 }
 0x315   :  { %277 = vrot.lane.b32.xlu1 %v230_v37, %s1776_s23 }
 0x31c   :  { %v242_v39 = vpop.permute.xlu0 %241 }
 0x31d   :  { %1519 = vmatpush.xpose.msk.msrb.mxu1 %vm245_vm10, %v242_v39  ;;  %1605 = vmatpush.xpose.msk.msra.mxu3 %vm245_vm10, %v242_v39 }
 0x320   :  { %1520 = vmatmul.msk.f32.vlgmr.msrb.gmra.mxu1 %vm245_vm10, %v194_v27  ;;  %1521 = vmatmul.msk.f32.vlgmr.msra.gmra.mxu3 %vm245_vm10, %v197_v29 }
 0x34f   :  { %v313_v46 = vpop.permute.xlu2 %312 }
 0x35f   :  { %v348_v49 = vpop.permute.xlu2 %347 }
 0x36f   :  { %v315_v42 = vpop.permute.xlu1 %314 }
 0x370   :  { %1526 = vmatpush.xpose.msk.msrb.mxu2 %vm245_vm10, %v315_v42 }
 0x374   :  { %1527 = vmatpush.xpose.msk.msrb.mxu2 %vm245_vm10, %v313_v46 }
 0x377   :  { %v350_v48 = vpop.permute.xlu1 %349  ;;  %1528 = vmatmul.msk.f32.vlgmr.msrb.gmra.mxu2 %vm245_vm10, %v234_v33 }
 0x378   :  { %528 = vmatpush.msra.mxu2 %v1980_v45  ;;  %1530 = vmatpush.xpose.msk.msrb.mxu3 %vm245_vm10, %v350_v48 }
 0x37a   :  { %529 = vmatpush.msra.mxu2 %v1984_v47 }
 0x37c   :  { %1531 = vmatpush.xpose.msk.msrb.mxu3 %vm245_vm10, %v348_v49 }
 0x37f   :  { %v280_v50 = vpop.permute.xlu0 %279  ;;  %1529 = vmatmul.msk.f32.gmra.mxu2 %vm245_vm10, %v236_v34  ;;  %1532 = vmatmul.msk.f32.vlgmr.msrb.gmra.mxu3 %vm245_vm10, %v238_v35 }
 0x380   :  { %1522 = vmatpush.xpose.msk.msra.mxu1 %vm245_vm10, %v280_v50 }
 0x387   :  { %v278_v51 = vpop.permute.xlu1 %277  ;;  %1533 = vmatmul.msk.f32.gmra.mxu3 %vm245_vm10, %v240_v31 }
 0x388   :  { %1523 = vmatpush.xpose.msk.msra.mxu1 %vm245_vm10, %v278_v51 }
 0x38b   :  { %1524 = vmatmul.msk.f32.vlgmr.msra.gmra.mxu1 %vm245_vm10, %v230_v37 }
 0x393   :  { %1525 = vmatmul.msk.f32.gmra.mxu1 %vm245_vm10, %v232_v36 }
 0x39d   :  { %v271_v59 = vpop.f32.mrf.mxu1 }
 0x39e   :  { %v272_v19 = vadd.f32 %v271_v59, %v2000_v58 }
 0x3a0   :  { %v383_v60 = vsel %vm382_vm0, %v272_v19, -inf }
 0x3a1   :  { %384 = vmax.xlane.f32.xlu0 %v383_v60 }
 0x3a3   :  { %v274_v62 = vpop.f32.mrf.mxu3 }
 0x3a4   :  { %v275_v63 = vadd.f32 %v274_v62, %v2005_v61  ;;  %v1620_v62 = vpack.i.bf16 %v1984_v47, %v1980_v45 }
 0x3a6   :  { %v386_v0 = vsel %vm382_vm0, %v275_v63, -inf }
 0x3a7   :  { %387 = vmax.xlane.f32.xlu2 %v386_v0 }
 0x3fa   :  { %v341_v1 = vpop.f32.mrf.mxu2 }
 0x3fb   :  { %v342_v2 = vadd.f32 %v341_v1, %v2000_v58 }
 0x3fd   :  { %v395_v20 = vsel %vm382_vm0, %v342_v2, -inf }
 0x3fe   :  { %396 = vmax.xlane.f32.xlu2 %v395_v20 }
 0x402   :  { %v344_v3 = vpop.f32.mrf.mxu2  ;;  %v376_v5 = vpop.f32.mrf.mxu3 }
 0x403   :  { %v345_v6 = vadd.f32 %v344_v3, %v2005_v61  ;;  %v377_v14 = vadd.f32 %v376_v5, %v2000_v58 }
 0x405   :  { %v398_v7 = vsel %vm382_vm0, %v345_v6, -inf  ;;  %v401_v18 = vsel %vm382_vm0, %v377_v14, -inf }
 0x406   :  { %399 = vmax.xlane.f32.xlu0 %v398_v7 }
 0x408   :  { %v306_v8 = vpop.f32.mrf.mxu1 }
 0x409   :  { %v307_v9 = vadd.f32 %v306_v8, %v2000_v58 }
 0x40a   :  { %v379_v10 = vpop.f32.mrf.mxu3 }
 0x40b   :  { %v2015_v11 = vadd.f32 %v379_v10, %v2005_v61  ;;  %v389_v12 = vsel %vm382_vm0, %v307_v9, -inf }
 0x40c   :  { %390 = vmax.xlane.f32.xlu1 %v389_v12 }
 0x40d   :  { %v404_v13 = vsel %vm382_vm0, %v2015_v11, -inf }
 0x40e   :  { %405 = vmax.xlane.f32.xlu0 %v404_v13 }
 0x410   :  { %v309_v15 = vpop.f32.mrf.mxu1 }
 0x411   :  { %v310_v16 = vadd.f32 %v309_v15, %v2005_v61 }
 0x413   :  { %v392_v17 = vsel %vm382_vm0, %v310_v16, -inf }
 0x414   :  { %v385_v21 = vpop.xlane.xlu0 %384  ;;  %393 = vmax.xlane.f32.xlu2 %v392_v17  ;;  %402 = vmax.xlane.f32.xlu1 %v401_v18 }
 0x415   :  { %v407_v22 = vsub.f32 %v272_v19, %v385_v21 }
 0x417   :  { %v415_v23 = vmul.f32 1.442695, %v407_v22 }
 0x419   :  { %1656 = vpow2.f32 %v415_v23 }
 0x41a   :  { %v388_v24 = vpop.xlane.xlu2 %387 }
 0x41b   :  { %v408_v25 = vsub.f32 %v275_v63, %v388_v24 }
 0x41d   :  { %v417_v27 = vmul.f32 1.442695, %v408_v25 }
 0x41f   :  { %v1657_v28 = vpop.eup %1656  ;;  %1658 = vpow2.f32 %v417_v27 }
 0x420   :  { %v431_v29 = vsel %vm382_vm0, %v1657_v28, 0.0 }
 0x421   :  { %432 = vadd.xlane.f32.xlu1 %v431_v29 }
 0x425   :  { %v1659_v31 = vpop.eup %1658 }
 0x426   :  { %v434_v32 = vsel %vm382_vm0, %v1659_v31, 0.0 }
 0x429   :  { %435 = vadd.xlane.f32.xlu1 %v434_v32 }
 0x471   :  { %v397_v33 = vpop.xlane.xlu2 %396 }
 0x472   :  { %v411_v34 = vsub.f32 %v342_v2, %v397_v33 }
 0x474   :  { %v423_v35 = vmul.f32 1.442695, %v411_v34 }
 0x476   :  { %1660 = vpow2.f32 %v423_v35 }
 0x479   :  { %v400_v39 = vpop.xlane.xlu0 %399 }
 0x47a   :  { %v412_v43 = vsub.f32 %v345_v6, %v400_v39 }
 0x47c   :  { %v1661_v36 = vpop.eup %1660  ;;  %v425_v46 = vmul.f32 1.442695, %v412_v43 }
 0x47d   :  { %v443_v37 = vsel %vm382_vm0, %v1661_v36, 0.0 }
 0x47e   :  { %444 = vadd.xlane.f32.xlu2 %v443_v37 }
 0x47f   :  { %v391_v40 = vpop.xlane.xlu1 %390 }
 0x480   :  { %v409_v42 = vsub.f32 %v307_v9, %v391_v40 }
 0x481   :  { %v406_v45 = vpop.xlane.xlu0 %405 }
 0x482   :  { %v419_v44 = vmul.f32 1.442695, %v409_v42  ;;  %v414_v47 = vsub.f32 %v2015_v11, %v406_v45 }
 0x484   :  { %1662 = vpow2.f32 %v419_v44  ;;  %v429_v6 = vmul.f32 1.442695, %v414_v47 }
 0x485   :  { %1664 = vpow2.f32 %v425_v46 }
 0x487   :  { %v403_v48 = vpop.xlane.xlu1 %402  ;;  %v394_v49 = vpop.xlane.xlu2 %393 }
 0x488   :  { %v413_v50 = vsub.f32 %v377_v14, %v403_v48  ;;  %v410_v53 = vsub.f32 %v310_v16, %v394_v49 }
 0x48a   :  { %v2027_v51 = vpop.eup %1662  ;;  %v427_v52 = vmul.f32 1.442695, %v413_v50  ;;  %v421_v55 = vmul.f32 1.442695, %v410_v53 }
 0x48b   :  { %v437_v54 = vsel %vm382_vm0, %v2027_v51, 0.0  ;;  %v1665_v56 = vpop.eup %1664 }
 0x48c   :  { %1666 = vpow2.f32 %v427_v52  ;;  %438 = vadd.xlane.f32.xlu0 %v437_v54  ;;  %v446_v59 = vsel %vm382_vm0, %v1665_v56, 0.0 }
 0x48d   :  { %1668 = vpow2.f32 %v421_v55 }
 0x492   :  { %v2031_v57 = vpop.eup %1666 }
 0x493   :  { %v449_v19 = vsel %vm382_vm0, %v2031_v57, 0.0  ;;  %v1669_v63 = vpop.eup %1668 }
 0x494   :  { %447 = vadd.xlane.f32.xlu0 %v446_v59  ;;  %v433_v60 = vpop.xlane.xlu1 %432  ;;  %450 = vadd.xlane.f32.xlu1 %v449_v19  ;;  %v440_v1 = vsel %vm382_vm0, %v1669_v63, 0.0 }
 0x495   :  { %1670 = vrcp.f32 %v433_v60 }
 0x496   :  { %1621 = vrot.lane.b32.xlu2 %v1620_v62, %s1779_s3 }
 0x49b   :  { %v1671_v0 = vpop.eup %1670 }
 0x49c   :  { %v463_v2 = vmul.f32 %v1671_v0, %v1657_v28  ;;  %v436_v20 = vpop.xlane.xlu1 %435  ;;  %441 = vadd.xlane.f32.xlu1 %v440_v1 }
 0x49d   :  { %1672 = vrcp.f32 %v436_v20 }
 0x49e   :  { %1536 = vmatmul.msk.f32.vlgmr.msra.gmra.mxu2 %vm382_vm0, %v463_v2  ;;  %1674 = vpow2.f32 %v429_v6 }
 0x4a3   :  { %v1673_v3 = vpop.eup %1672 }
 0x4a4   :  { %v464_v5 = vmul.f32 %v1673_v3, %v1659_v31  ;;  %v1675_v7 = vpop.eup %1674 }
 0x4a5   :  { %v452_v8 = vsel %vm382_vm0, %v1675_v7, 0.0 }
 0x4a6   :  { %1537 = vmatmul.msk.f32.gmra.mxu2 %vm382_vm0, %v464_v5 }
 0x4a8   :  { %1626 = vrot.lane.b32.xlu0 %v1620_v62, %s1776_s23 }
 0x4b5   :  { %1631 = vrot.lane.b32.xlu1 %v1620_v62, %s1780_s26 }
 0x4bf   :  { %453 = vadd.xlane.f32.xlu2 %v452_v8  ;;  %v669_v8 = vld [vmem:[%s2393_s7 + $0x18] sm:$0xff] }
 0x4f1   :  { %v445_v9 = vpop.xlane.xlu2 %444 }
 0x4f2   :  { %1676 = vrcp.f32 %v445_v9  ;;  %v668_v9 = vld [vmem:[%s2393_s7 + $0x10] sm:$0xff] }
 0x4f8   :  { %v1677_v12 = vpop.eup %1676 }
 0x4f9   :  { %v1622_v10 = vpop.permute.xlu2 %1621  ;;  %v467_v15 = vmul.f32 %v1677_v12, %v1661_v36  ;;  %v666_v12 = vld [vmem:[%s2393_s7] sm:$0xff] }
 0x4fa   :  { %v1623_v13 = vunpack.i.l.bf16 %v1622_v10  ;;  %v1624_v14 = vunpack.i.h.bf16 %v1622_v10  ;;  %v667_v10 = vld [vmem:[%s2393_s7 + $0x8] sm:$0xff] }
 0x4fc   :  { %563 = vmatpush.msra.mxu3 %v1623_v13 }
 0x4fe   :  { %564 = vmatpush.msra.mxu3 %v1624_v14 }
 0x4ff   :  { %v439_v16 = vpop.xlane.xlu0 %438  ;;  %1538 = vmatmul.msk.f32.vlgmr.msra.gmra.mxu3 %vm382_vm0, %v467_v15 }
 0x507   :  { %v448_v11 = vpop.xlane.xlu0 %447  ;;  %v451_v21 = vpop.xlane.xlu1 %450 }
 0x508   :  { %1678 = vrcp.f32 %v448_v11 }
 0x509   :  { %1680 = vrcp.f32 %v439_v16 }
 0x50e   :  { %v1679_v17 = vpop.eup %1678 }
 0x50f   :  { %v468_v18 = vmul.f32 %v1679_v17, %v1665_v56  ;;  %v442_v22 = vpop.xlane.xlu1 %441  ;;  %v1681_v24 = vpop.eup %1680  ;;  %v733_v17 = vld [vmem:[%s2394_s8 + $0x78] sm:$0xff] }
 0x510   :  { %1682 = vrcp.f32 %v442_v22  ;;  %v465_v28 = vmul.f32 %v1681_v24, %v2027_v51  ;;  %v613_v51 = vperm.slane %v1944_v4, 5  ;;  %735 = vmatpush.msrb.mxu2 %v733_v17  ;;  %v731_v22 = vld [vmem:[%s2394_s8 + $0x68] sm:$0xff] }
 0x511   :  { %1539 = vmatmul.msk.f32.gmra.mxu3 %vm382_vm0, %v468_v18  ;;  %1684 = vrcp.f32 %v451_v21  ;;  %v732_v18 = vld [vmem:[%s2394_s8 + $0x70] sm:$0xff] }
 0x512   :  { %736 = vmatpush.msrb.mxu2 %v732_v18 }
 0x514   :  { %737 = vmatpush.msrb.mxu2 %v731_v22 }
 0x516   :  { %v1683_v29 = vpop.eup %1682 }
 0x517   :  { %v466_v31 = vmul.f32 %v1683_v29, %v1669_v63  ;;  %v1685_v33 = vpop.eup %1684 }
 0x518   :  { %v469_v36 = vmul.f32 %v1685_v33, %v2031_v57 }
 0x51a   :  { %v1627_v23 = vpop.permute.xlu0 %1626 }
 0x51b   :  { %v1628_v25 = vunpack.i.l.bf16 %v1627_v23  ;;  %v1629_v27 = vunpack.i.h.bf16 %v1627_v23 }
 0x51d   :  { %499 = vmatpush.msrb.mxu1 %v1628_v25 }
 0x51f   :  { %500 = vmatpush.msrb.mxu1 %v1629_v27  ;;  %v730_v27 = vld [vmem:[%s2394_s8 + $0x60] sm:$0xff] }
 0x520   :  { %1534 = vmatmul.msk.f32.vlgmr.msrb.gmra.mxu1 %vm382_vm0, %v465_v28  ;;  %738 = vmatpush.msrb.mxu2 %v730_v27 }
 0x521   :  { %v531_v43 = vpop.f32.mrf.mxu2  ;;  %689 = vmatpush.msra.mxu1 %v669_v8 }
 0x523   :  { %690 = vmatpush.msra.mxu1 %v668_v9 }
 0x525   :  { %691 = vmatpush.msra.mxu1 %v667_v10 }
 0x527   :  { %v1632_v32 = vpop.permute.xlu1 %1631  ;;  %692 = vmatpush.msra.mxu1 %v666_v12 }
 0x528   :  { %1535 = vmatmul.msk.f32.gmra.mxu1 %vm382_vm0, %v466_v31  ;;  %v1633_v34 = vunpack.i.l.bf16 %v1632_v32  ;;  %v1634_v35 = vunpack.i.h.bf16 %v1632_v32  ;;  %v660_v32 = vperm.slane %v1944_v4, 2 }
 0x529   :  { %v534_v56 = vpop.f32.mrf.mxu2 }
 0x52a   :  { %600 = vmatpush.msrb.mxu0 %v1633_v34 }
 0x52c   :  { %601 = vmatpush.msrb.mxu0 %v1634_v35  ;;  %v663_v35 = vperm.slane %v1944_v4, 3 }
 0x52d   :  { %1540 = vmatmul.msk.f32.vlgmr.msrb.gmra.mxu0 %vm382_vm0, %v469_v36 }
 0x532   :  { %v454_v37 = vpop.xlane.xlu2 %453 }
 0x533   :  { %1686 = vrcp.f32 %v454_v37 }
 0x539   :  { %v1687_v39 = vpop.eup %1686 }
 0x53a   :  { %v470_v40 = vmul.f32 %v1687_v39, %v1675_v7 }
 0x53c   :  { %1541 = vmatmul.msk.f32.gmra.mxu0 %vm382_vm0, %v470_v40 }
 0x582   :  { %v566_v46 = vpop.f32.mrf.mxu3 }
 0x594   :  { %v569_v59 = vpop.f32.mrf.mxu3 }
 0x59d   :  { %v502_v42 = vpop.f32.mrf.mxu1 }
 0x59e   :  { %v532_v44 = vadd.f32 %v531_v43, %v502_v42 }
 0x5a0   :  { %v572_v48 = vadd.f32 %v566_v46, %v532_v44 }
 0x5a5   :  { %v505_v54 = vpop.f32.mrf.mxu1 }
 0x5a6   :  { %v535_v57 = vadd.f32 %v534_v56, %v505_v54  ;;  %v728_v54 = vld [vmem:[%s2394_s8 + $0x50] sm:$0xff]  ;;  %v726_v56 = vld [vmem:[%s2394_s8 + $0x40] sm:$0xff] }
 0x5a8   :  { %v573_v19 = vadd.f32 %v569_v59, %v535_v57  ;;  %v725_v57 = vld [vmem:[%s2394_s8 + $0x38] sm:$0xff]  ;;  %v724_v59 = vld [vmem:[%s2394_s8 + $0x30] sm:$0xff] }
 0x5aa   :  { %v603_v49 = vpop.f32.mrf.mxu0 }
 0x5ab   :  { %v609_v50 = vadd.f32 %v603_v49, %v572_v48 }
 0x5ad   :  { %v611_v52 = vadd.f32 %v609_v50, %v1896_v26 }
 0x5af   :  { %v2056_v53 = vadd.f32 %v613_v51, %v611_v52  ;;  %v729_v52 = vld [vmem:[%s2394_s8 + $0x58] sm:$0xff] }
 0x5b0   :  { %739 = vmatpush.msrb.mxu2 %v729_v52  ;;  %v1544_v52 = vld [vmem:[%s2391_s5 + $0x20] sm:$0xff] }
 0x5b1   :  { %v616_v55 = vsel %vm107_vm2, %v2056_v53, 0.0 }
 0x5b2   :  { %617 = vadd.xlane.f32.xlu0 %v616_v55  ;;  %740 = vmatpush.msrb.mxu2 %v728_v54  ;;  %v727_v55 = vld [vmem:[%s2394_s8 + $0x48] sm:$0xff]  ;;  %v1550_v54 = vld [vmem:[%s2392_s6 + $0x20] sm:$0xff] }
 0x5b4   :  { %741 = vmatpush.msrb.mxu2 %v727_v55 }
 0x5b6   :  { %742 = vmatpush.msrb.mxu2 %v726_v56 }
 0x5b8   :  { %743 = vmatpush.msrb.mxu2 %v725_v57 }
 0x5b9   :  { %v606_v60 = vpop.f32.mrf.mxu0 }
 0x5ba   :  { %v610_v62 = vadd.f32 %v606_v60, %v573_v19  ;;  %v723_v19 = vld [vmem:[%s2394_s8 + $0x28] sm:$0xff]  ;;  %744 = vmatpush.msrb.mxu2 %v724_v59  ;;  %v722_v60 = vld [vmem:[%s2394_s8 + $0x20] sm:$0xff] }
 0x5bc   :  { %v612_v63 = vadd.f32 %v610_v62, %v1903_v30  ;;  %745 = vmatpush.msrb.mxu2 %v723_v19  ;;  %v721_v62 = vld [vmem:[%s2394_s8 + $0x18] sm:$0xff] }
 0x5be   :  { %v2061_v0 = vadd.f32 %v613_v51, %v612_v63  ;;  %746 = vmatpush.msrb.mxu2 %v722_v60  ;;  %v720_v63 = vld [vmem:[%s2394_s8 + $0x10] sm:$0xff] }
 0x5c0   :  { %v619_v26 = vsel %vm107_vm2, %v2061_v0, 0.0  ;;  %747 = vmatpush.msrb.mxu2 %v721_v62 }
 0x5c1   :  { %620 = vadd.xlane.f32.xlu1 %v619_v26  ;;  %v719_v26 = vld [vmem:[%s2394_s8 + $0x8] sm:$0xff] }
 0x5c2   :  { %748 = vmatpush.msrb.mxu2 %v720_v63 }
 0x5c4   :  { %749 = vmatpush.msrb.mxu2 %v719_v26 }
 0x625   :  { %v618_v1 = vpop.xlane.xlu0 %617 }
 0x626   :  { %v622_v2 = vmul.f32 %v618_v1, %v1907_v38  ;;  %v718_v1 = vld [vmem:[%s2394_s8] sm:$0xff] }
 0x627   :  { %750 = vmatpush.msrb.mxu2 %v718_v1 }
 0x628   :  { %v624_v20 = vsub.f32 %v2056_v53, %v622_v2  ;;  %v670_v2 = vperm.slane %v1944_v4, 6 }
 0x62a   :  { %v626_v3 = vmul.f32 %v624_v20, %v624_v20 }
 0x62c   :  { %v628_v5 = vsel %vm107_vm2, %v626_v3, 0.0 }
 0x62d   :  { %629 = vadd.xlane.f32.xlu2 %v628_v5 }
 0x634   :  { %v621_v45 = vpop.xlane.xlu1 %620 }
 0x635   :  { %v623_v47 = vmul.f32 %v621_v45, %v1907_v38 }
 0x637   :  { %v625_v30 = vsub.f32 %v2061_v0, %v623_v47 }
 0x639   :  { %v627_v6 = vmul.f32 %v625_v30, %v625_v30 }
 0x63b   :  { %v631_v7 = vsel %vm107_vm2, %v627_v6, 0.0 }
 0x63c   :  { %632 = vadd.xlane.f32.xlu0 %v631_v7 }
 0x6a0   :  { %v630_v13 = vpop.xlane.xlu2 %629 }
 0x6a1   :  { %v634_v14 = vmul.f32 %v630_v13, %v1907_v38 }
 0x6a3   :  { %v636_v15 = vadd.f32 1e-05, %v634_v14 }
 0x6a5   :  { %1688 = vrsqrt.f32 %v636_v15  ;;  %vm644_vm4 = vweird.f32 %v636_v15 }
 0x6ab   :  { %v1689_v16 = vpop.eup %1688 }
 0x6ac   :  { %v639_v11 = vmul.f32 %v1689_v16, %v636_v15  ;;  %vm645_vm3 = vweird.f32 %v1689_v16 }
 0x6ad   :  { %vm646_vm5 = vmor %vm644_vm4, %vm645_vm3 }
 0x6ae   :  { %v640_v21 = vmul.f32 %v1689_v16, %v639_v11 }
 0x6af   :  { %v633_v23 = vpop.xlane.xlu0 %632 }
 0x6b0   :  { %v641_v24 = vmul.f32 0.5, %v640_v21  ;;  %v635_v25 = vmul.f32 %v633_v23, %v1907_v38 }
 0x6b2   :  { %v642_v28 = vsub.f32 1.5, %v641_v24  ;;  %v637_v29 = vadd.f32 1e-05, %v635_v25  ;;  %v734_v24 = vperm.slane %v1944_v4, 7 }
 0x6b4   :  { %v643_v31 = vmul.f32 %v1689_v16, %v642_v28  ;;  %1690 = vrsqrt.f32 %v637_v29  ;;  %vm654_vm7 = vweird.f32 %v637_v29 }
 0x6b6   :  { %v647_v33 = vsel %vm646_vm5, %v1689_v16, %v643_v31 }
 0x6b7   :  { %v658_v34 = vmul.f32 %v647_v33, %v624_v20 }
 0x6b9   :  { %v661_v36 = vmul.f32 %v660_v32, %v658_v34 }
 0x6ba   :  { %v1691_v37 = vpop.eup %1690 }
 0x6bb   :  { %v649_v39 = vmul.f32 %v1691_v37, %v637_v29  ;;  %v664_v40 = vadd.f32 %v663_v35, %v661_v36  ;;  %vm655_vm6 = vweird.f32 %v1691_v37 }
 0x6bc   :  { %vm656_vm8 = vmor %vm654_vm7, %vm655_vm6 }
 0x6bd   :  { %v650_v42 = vmul.f32 %v1691_v37, %v649_v39  ;;  %1542 = vmatmul.msk.f32.vlgmr.msra.gmra.mxu1 %vm107_vm2, %v664_v40 }
 0x6bf   :  { %v651_v43 = vmul.f32 0.5, %v650_v42 }
 0x6c1   :  { %v652_v44 = vsub.f32 1.5, %v651_v43 }
 0x6c3   :  { %v653_v46 = vmul.f32 %v1691_v37, %v652_v44  ;;  %v1547_v44 = vld [vmem:[%s2391_s5 + $0x38] sm:$0xff] }
 0x6c4   :  { %834 = vmatpush.msrb.mxu3 %v1547_v44 }
 0x6c5   :  { %v657_v48 = vsel %vm656_vm8, %v1691_v37, %v653_v46  ;;  %v1553_v46 = vld [vmem:[%s2392_s6 + $0x38] sm:$0xff] }
 0x6c6   :  { %v659_v49 = vmul.f32 %v657_v48, %v625_v30  ;;  %863 = vmatpush.msra.mxu0 %v1553_v46  ;;  %v1546_v48 = vld [vmem:[%s2391_s5 + $0x30] sm:$0xff] }
 0x6c7   :  { %835 = vmatpush.msrb.mxu3 %v1546_v48 }
 0x6c8   :  { %v662_v50 = vmul.f32 %v660_v32, %v659_v49  ;;  %v1552_v49 = vld [vmem:[%s2392_s6 + $0x30] sm:$0xff] }
 0x6c9   :  { %864 = vmatpush.msra.mxu0 %v1552_v49 }
 0x6ca   :  { %v665_v51 = vadd.f32 %v663_v35, %v662_v50  ;;  %v1545_v50 = vld [vmem:[%s2391_s5 + $0x28] sm:$0xff]  ;;  %s1783_s5 = smov 8  }
 0x6cb   :  { %836 = vmatpush.msrb.mxu3 %v1545_v50 }
 0x6cc   :  { %1543 = vmatmul.msk.f32.gmra.mxu1 %vm107_vm2, %v665_v51  ;;  %v1551_v51 = vld [vmem:[%s2392_s6 + $0x28] sm:$0xff] }
 0x6cd   :  { %865 = vmatpush.msra.mxu0 %v1551_v51  ;;  %837 = vmatpush.msrb.mxu3 %v1544_v52 }
 0x6cf   :  { %866 = vmatpush.msra.mxu0 %v1550_v54 }
 0x73a   :  { %v694_v20 = vpop.f32.mrf.mxu1 }
 0x73b   :  { %v695_v3 = vadd.f32 %v694_v20, %v670_v2 }
 0x73d   :  { %v702_v5 = vmul.f32 0.044715, %v695_v3  ;;  %v700_v12 = vmul.f32 0.5, %v695_v3 }
 0x73f   :  { %v704_v45 = vmul.f32 %v702_v5, %v695_v3 }
 0x741   :  { %v706_v47 = vmul.f32 %v704_v45, %v695_v3 }
 0x743   :  { %v708_v30 = vadd.f32 %v706_v47, %v695_v3  ;;  %v804_v3 = vperm.slane %v1976_v41, 1  ;;  %v807_v47 = vperm.slane %v1976_v41, 2 }
 0x745   :  { %v710_v6 = vmul.f32 0.7978846, %v708_v30 }
 0x747   :  { %1692 = vtanh.f32 %v710_v6 }
 0x749   :  { %v697_v7 = vpop.f32.mrf.mxu1 }
 0x74a   :  { %v698_v8 = vadd.f32 %v697_v7, %v670_v2 }
 0x74c   :  { %v703_v9 = vmul.f32 0.044715, %v698_v8  ;;  %v701_v21 = vmul.f32 0.5, %v698_v8 }
 0x74d   :  { %v1693_v10 = vpop.eup %1692 }
 0x74e   :  { %v714_v13 = vadd.f32 1.0, %v1693_v10  ;;  %v705_v14 = vmul.f32 %v703_v9, %v698_v8 }
 0x750   :  { %v716_v15 = vmul.f32 %v714_v13, %v700_v12  ;;  %v707_v16 = vmul.f32 %v705_v14, %v698_v8 }
 0x752   :  { %751 = vmatmul.f32.vlgmr.msrb.gmra.mxu2 %v716_v15  ;;  %v709_v11 = vadd.f32 %v707_v16, %v698_v8 }
 0x754   :  { %v711_v17 = vmul.f32 0.7978846, %v709_v11 }
 0x756   :  { %1694 = vtanh.f32 %v711_v17  ;;  %v815_v17 = vperm.slane %v1976_v41, 5 }
 0x75c   :  { %v1695_v18 = vpop.eup %1694 }
 0x75d   :  { %v715_v22 = vadd.f32 1.0, %v1695_v18 }
 0x75f   :  { %v717_v23 = vmul.f32 %v715_v22, %v701_v21 }
 0x761   :  { %754 = vmatmul.f32.gmra.mxu2 %v717_v23 }
 0x7d5   :  { %v752_v25 = vpop.f32.mrf.mxu2 }
 0x7d6   :  { %v753_v27 = vadd.f32 %v752_v25, %v734_v24 }
 0x7d8   :  { %v2140_v28 = vadd.f32 %v753_v27, %v2056_v53 }
 0x7da   :  { %v760_v29 = vsel %vm107_vm2, %v2140_v28, 0.0 }
 0x7db   :  { %761 = vadd.xlane.f32.xlu2 %v760_v29 }
 0x7e4   :  { %v755_v31 = vpop.f32.mrf.mxu2 }
 0x7e5   :  { %v756_v32 = vadd.f32 %v755_v31, %v734_v24 }
 0x7e7   :  { %v2145_v33 = vadd.f32 %v756_v32, %v2061_v0 }
 0x7e9   :  { %v763_v34 = vsel %vm107_vm2, %v2145_v33, 0.0 }
 0x7ea   :  { %764 = vadd.xlane.f32.xlu0 %v763_v34 }
 0x84e   :  { %v762_v35 = vpop.xlane.xlu2 %761 }
 0x84f   :  { %v766_v4 = vmul.f32 %v762_v35, %v1907_v38 }
 0x851   :  { %v768_v36 = vsub.f32 %v2140_v28, %v766_v4  ;;  %v2209_v4 = vld [vmem:[%s2390_s4 + $0x10] sm:$0xf] }
 0x853   :  { %v770_v53 = vmul.f32 %v768_v36, %v768_v36 }
 0x855   :  { %v772_v37 = vsel %vm107_vm2, %v770_v53, 0.0 }
 0x856   :  { %773 = vadd.xlane.f32.xlu2 %v772_v37  ;;  %v850_v37 = vperm.slane %v2209_v4, 1 }
 0x85d   :  { %v765_v39 = vpop.xlane.xlu0 %764 }
 0x85e   :  { %v767_v40 = vmul.f32 %v765_v39, %v1907_v38 }
 0x860   :  { %v769_v42 = vsub.f32 %v2145_v33, %v767_v40 }
 0x862   :  { %v771_v0 = vmul.f32 %v769_v42, %v769_v42 }
 0x864   :  { %v775_v43 = vsel %vm107_vm2, %v771_v0, 0.0 }
 0x865   :  { %776 = vadd.xlane.f32.xlu1 %v775_v43 }
 0x8c9   :  { %v774_v55 = vpop.xlane.xlu2 %773 }
 0x8ca   :  { %v778_v56 = vmul.f32 %v774_v55, %v1907_v38 }
 0x8cc   :  { %v780_v57 = vadd.f32 1e-05, %v778_v56 }
 0x8ce   :  { %1696 = vrsqrt.f32 %v780_v57  ;;  %vm788_vm11 = vweird.f32 %v780_v57 }
 0x8d4   :  { %v1697_v59 = vpop.eup %1696 }
 0x8d5   :  { %v783_v19 = vmul.f32 %v1697_v59, %v780_v57  ;;  %vm789_vm9 = vweird.f32 %v1697_v59 }
 0x8d6   :  { %vm790_vm12 = vmor %vm788_vm11, %vm789_vm9 }
 0x8d7   :  { %v784_v60 = vmul.f32 %v1697_v59, %v783_v19 }
 0x8d8   :  { %v777_v62 = vpop.xlane.xlu1 %776 }
 0x8d9   :  { %v785_v63 = vmul.f32 0.5, %v784_v60  ;;  %v779_v26 = vmul.f32 %v777_v62, %v1907_v38 }
 0x8db   :  { %v786_v1 = vsub.f32 1.5, %v785_v63  ;;  %v781_v2 = vadd.f32 1e-05, %v779_v26 }
 0x8dd   :  { %v787_v20 = vmul.f32 %v1697_v59, %v786_v1  ;;  %1698 = vrsqrt.f32 %v781_v2  ;;  %vm798_vm14 = vweird.f32 %v781_v2 }
 0x8df   :  { %v791_v5 = vsel %vm790_vm12, %v1697_v59, %v787_v20 }
 0x8e0   :  { %v802_v45 = vmul.f32 %v791_v5, %v768_v36 }
 0x8e2   :  { %v805_v30 = vmul.f32 %v804_v3, %v802_v45 }
 0x8e3   :  { %v1699_v6 = vpop.eup %1698 }
 0x8e4   :  { %v793_v7 = vmul.f32 %v1699_v6, %v781_v2  ;;  %v808_v8 = vadd.f32 %v807_v47, %v805_v30  ;;  %vm799_vm13 = vweird.f32 %v1699_v6 }
 0x8e5   :  { %vm800_vm15 = vmor %vm798_vm14, %vm799_vm13 }
 0x8e6   :  { %v794_v9 = vmul.f32 %v1699_v6, %v793_v7  ;;  %1548 = vmatmul.msk.f32.vlgmr.msrb.gmra.mxu3 %vm107_vm2, %v808_v8  ;;  %1554 = vmatmul.msk.f32.vlgmr.msra.gmra.mxu0 %vm107_vm2, %v808_v8 }
 0x8e8   :  { %v795_v10 = vmul.f32 0.5, %v794_v9 }
 0x8ea   :  { %v796_v12 = vsub.f32 1.5, %v795_v10 }
 0x8ec   :  { %v797_v13 = vmul.f32 %v1699_v6, %v796_v12 }
 0x8ee   :  { %v801_v14 = vsel %vm800_vm15, %v1699_v6, %v797_v13 }
 0x8ef   :  { %v803_v15 = vmul.f32 %v801_v14, %v769_v42 }
 0x8f1   :  { %v806_v16 = vmul.f32 %v804_v3, %v803_v15 }
 0x8f3   :  { %v809_v11 = vadd.f32 %v807_v47, %v806_v16 }
 0x8f5   :  { %1549 = vmatmul.msk.f32.gmra.mxu3 %vm107_vm2, %v809_v11  ;;  %1555 = vmatmul.msk.f32.gmra.mxu0 %vm107_vm2, %v809_v11 }
 0x963   :  { %v868_v35 = vpop.f32.mrf.mxu0 }
 0x964   :  { %v869_v42 = vadd.f32 %v868_v35, %v850_v37 }
 0x969   :  { %v839_v18 = vpop.f32.mrf.mxu3 }
 0x96a   :  { %v840_v21 = vadd.f32 %v839_v18, %v815_v17 }
 0x96c   :  { %876 = vrot.lane.b32.xlu2 %v840_v21, %s1777_s24 }
 0x972   :  { %v871_v53 = vpop.f32.mrf.mxu0 }
 0x973   :  { %v2213_v40 = vadd.f32 %v871_v53, %v850_v37 }
 0x974   :  { %880 = vrot.lane.b32.xlu2 %v840_v21, %s1774_s21 }
 0x975   :  { %v1635_v16 = vpack.i.bf16 %v869_v42, %v2213_v40 }
 0x978   :  { %v842_v22 = vpop.f32.mrf.mxu3 }
 0x979   :  { %v843_v23 = vadd.f32 %v842_v22, %v815_v17 }
 0x97b   :  { %882 = vrot.lane.b32.xlu1 %v843_v23, %s1774_s21  ;;  %878 = vrot.lane.b32.xlu0 %v843_v23, %s1777_s24 }
 0x983   :  { %890 = vrot.lane.b32.xlu1 %v843_v23, %s1776_s23  ;;  %886 = vrot.lane.b32.xlu0 %v843_v23, %s1775_s22 }
 0x98b   :  { %884 = vrot.lane.b32.xlu0 %v840_v21, %s1775_s22 }
 0x993   :  { %888 = vrot.lane.b32.xlu0 %v840_v21, %s1776_s23 }
 0x9c6   :  { %v877_v41 = vpop.permute.xlu2 %876 }
 0x9c7   :  { %923 = vrot.lane.b32.xlu1 %v877_v41, %s1776_s23 }
 0x9ce   :  { %v881_v24 = vpop.permute.xlu2 %880 }
 0x9cf   :  { %958 = vrot.lane.b32.xlu1 %v881_v24, %s1776_s23 }
 0x9ed   :  { %v883_v25 = vpop.permute.xlu1 %882  ;;  %v879_v27 = vpop.permute.xlu0 %878 }
 0x9ee   :  { %925 = vrot.lane.b32.xlu2 %v879_v27, %s1776_s23 }
 0x9f5   :  { %v891_v29 = vpop.permute.xlu1 %890  ;;  %v887_v31 = vpop.permute.xlu0 %886 }
 0x9f6   :  { %1556 = vmatpush.xpose.msk.msrb.mxu1 %vm245_vm10, %v891_v29  ;;  %960 = vrot.lane.b32.xlu2 %v883_v25, %s1776_s23 }
 0x9f7   :  { %995 = vrot.lane.b32.xlu0 %v887_v31, %s1776_s23 }
 0x9fd   :  { %v885_v32 = vpop.permute.xlu0 %884 }
 0x9fe   :  { %993 = vrot.lane.b32.xlu2 %v885_v32, %s1776_s23 }
 0xa05   :  { %v889_v34 = vpop.permute.xlu0 %888 }
 0xa06   :  { %1557 = vmatpush.xpose.msk.msrb.mxu1 %vm245_vm10, %v889_v34 }
 0xa09   :  { %1558 = vmatmul.msk.f32.vlgmr.msrb.gmra.mxu1 %vm245_vm10, %v840_v21 }
 0xa11   :  { %1559 = vmatmul.msk.f32.gmra.mxu1 %vm245_vm10, %v843_v23 }
 0xa39   :  { %v924_v39 = vpop.permute.xlu1 %923 }
 0xa41   :  { %v959_v43 = vpop.permute.xlu1 %958 }
 0xa48   :  { %v926_v36 = vpop.permute.xlu2 %925 }
 0xa49   :  { %1560 = vmatpush.xpose.msk.msra.mxu3 %vm245_vm10, %v926_v36 }
 0xa4d   :  { %1561 = vmatpush.xpose.msk.msra.mxu3 %vm245_vm10, %v924_v39 }
 0xa50   :  { %1562 = vmatmul.msk.f32.vlgmr.msra.gmra.mxu3 %vm245_vm10, %v877_v41  ;;  %v961_v0 = vpop.permute.xlu2 %960 }
 0xa51   :  { %1173 = vmatpush.msrb.mxu3 %v2213_v40  ;;  %1564 = vmatpush.xpose.msk.msrb.mxu0 %vm245_vm10, %v961_v0 }
 0xa53   :  { %1174 = vmatpush.msrb.mxu3 %v869_v42 }
 0xa55   :  { %1565 = vmatpush.xpose.msk.msrb.mxu0 %vm245_vm10, %v959_v43 }
 0xa58   :  { %1563 = vmatmul.msk.f32.gmra.mxu3 %vm245_vm10, %v879_v27  ;;  %1566 = vmatmul.msk.f32.vlgmr.msrb.gmra.mxu0 %vm245_vm10, %v881_v24  ;;  %v994_v46 = vpop.permute.xlu2 %993 }
 0xa60   :  { %1567 = vmatmul.msk.f32.gmra.mxu0 %vm245_vm10, %v883_v25 }
 0xa69   :  { %v996_v44 = vpop.permute.xlu0 %995 }
 0xa6a   :  { %1568 = vmatpush.xpose.msk.msra.mxu1 %vm245_vm10, %v996_v44 }
 0xa6e   :  { %1569 = vmatpush.xpose.msk.msra.mxu1 %vm245_vm10, %v994_v46 }
 0xa71   :  { %1570 = vmatmul.msk.f32.vlgmr.msra.gmra.mxu1 %vm245_vm10, %v885_v32 }
 0xa79   :  { %1571 = vmatmul.msk.f32.gmra.mxu1 %vm245_vm10, %v887_v31 }
 0xa86   :  { %v917_v48 = vpop.f32.mrf.mxu1 }
 0xa87   :  { %v918_v49 = vadd.f32 %v917_v48, %v2000_v58 }
 0xa89   :  { %v1028_v50 = vsel %vm382_vm0, %v918_v49, -inf }
 0xa8a   :  { %1029 = vmax.xlane.f32.xlu0 %v1028_v50 }
 0xa8e   :  { %v920_v51 = vpop.f32.mrf.mxu1 }
 0xa8f   :  { %v921_v52 = vadd.f32 %v920_v51, %v2005_v61 }
 0xa91   :  { %v1031_v54 = vsel %vm382_vm0, %v921_v52, -inf }
 0xa92   :  { %1032 = vmax.xlane.f32.xlu2 %v1031_v54 }
 0xad3   :  { %v952_v55 = vpop.f32.mrf.mxu3 }
 0xad4   :  { %v953_v56 = vadd.f32 %v952_v55, %v2000_v58 }
 0xad5   :  { %v987_v57 = vpop.f32.mrf.mxu0 }
 0xad6   :  { %v1034_v59 = vsel %vm382_vm0, %v953_v56, -inf  ;;  %v988_v19 = vadd.f32 %v987_v57, %v2000_v58 }
 0xad7   :  { %1035 = vmax.xlane.f32.xlu1 %v1034_v59 }
 0xad8   :  { %v1040_v63 = vsel %vm382_vm0, %v988_v19, -inf }
 0xadb   :  { %v955_v60 = vpop.f32.mrf.mxu3 }
 0xadc   :  { %v956_v62 = vadd.f32 %v955_v60, %v2005_v61 }
 0xadd   :  { %v990_v1 = vpop.f32.mrf.mxu0 }
 0xade   :  { %v1037_v26 = vsel %vm382_vm0, %v956_v62, -inf  ;;  %v991_v2 = vadd.f32 %v990_v1, %v2005_v61 }
 0xadf   :  { %1041 = vmax.xlane.f32.xlu1 %v1040_v63  ;;  %1038 = vmax.xlane.f32.xlu0 %v1037_v26 }
 0xae0   :  { %v1043_v20 = vsel %vm382_vm0, %v991_v2, -inf }
 0xae7   :  { %1044 = vmax.xlane.f32.xlu0 %v1043_v20 }
 0xaee   :  { %v1022_v3 = vpop.f32.mrf.mxu1 }
 0xaef   :  { %v1023_v5 = vadd.f32 %v1022_v3, %v2000_v58 }
 0xaf1   :  { %v1046_v45 = vsel %vm382_vm0, %v1023_v5, -inf }
 0xaf2   :  { %1047 = vmax.xlane.f32.xlu2 %v1046_v45 }
 0xaf6   :  { %v1025_v47 = vpop.f32.mrf.mxu1 }
 0xaf7   :  { %v1026_v30 = vadd.f32 %v1025_v47, %v2005_v61 }
 0xaf9   :  { %v1049_v6 = vsel %vm382_vm0, %v1026_v30, -inf }
 0xafa   :  { %1050 = vmax.xlane.f32.xlu1 %v1049_v6 }
 0xafd   :  { %v1030_v7 = vpop.xlane.xlu0 %1029 }
 0xafe   :  { %v1052_v8 = vsub.f32 %v918_v49, %v1030_v7 }
 0xb00   :  { %v1060_v9 = vmul.f32 1.442695, %v1052_v8 }
 0xb02   :  { %1700 = vpow2.f32 %v1060_v9 }
 0xb05   :  { %v1033_v10 = vpop.xlane.xlu2 %1032 }
 0xb06   :  { %v1053_v12 = vsub.f32 %v921_v52, %v1033_v10 }
 0xb08   :  { %v1701_v13 = vpop.eup %1700  ;;  %v1062_v14 = vmul.f32 1.442695, %v1053_v12 }
 0xb09   :  { %v1076_v15 = vsel %vm382_vm0, %v1701_v13, 0.0 }
 0xb0a   :  { %1702 = vpow2.f32 %v1062_v14  ;;  %1077 = vadd.xlane.f32.xlu2 %v1076_v15 }
 0xb10   :  { %v1703_v58 = vpop.eup %1702 }
 0xb11   :  { %v1079_v61 = vsel %vm382_vm0, %v1703_v58, 0.0 }
 0xb12   :  { %1080 = vadd.xlane.f32.xlu2 %v1079_v61 }
 0xb13   :  { %1636 = vrot.lane.b32.xlu1 %v1635_v16, %s1776_s23 }
 0xb1b   :  { %1646 = vrot.lane.b32.xlu1 %v1635_v16, %s1780_s26 }
 0xb4a   :  { %v1036_v11 = vpop.xlane.xlu1 %1035 }
 0xb4b   :  { %v1054_v25 = vsub.f32 %v953_v56, %v1036_v11 }
 0xb4d   :  { %v1064_v31 = vmul.f32 1.442695, %v1054_v25 }
 0xb52   :  { %v1042_v17 = vpop.xlane.xlu1 %1041  ;;  %v1039_v29 = vpop.xlane.xlu0 %1038 }
 0xb53   :  { %v1056_v18 = vsub.f32 %v988_v19, %v1042_v17  ;;  %v1055_v34 = vsub.f32 %v956_v62, %v1039_v29  ;;  %v2270_v29 = vld [vmem:[%s2390_s4 + $0x8] sm:$0xff] }
 0xb55   :  { %v1068_v21 = vmul.f32 1.442695, %v1056_v18  ;;  %v1066_v36 = vmul.f32 1.442695, %v1055_v34 }
 0xb57   :  { %1704 = vpow2.f32 %v1068_v21 }
 0xb5a   :  { %v1045_v53 = vpop.xlane.xlu0 %1044 }
 0xb5b   :  { %v1057_v39 = vsub.f32 %v991_v2, %v1045_v53 }
 0xb5d   :  { %v2248_v22 = vpop.eup %1704  ;;  %v1070_v42 = vmul.f32 1.442695, %v1057_v39 }
 0xb5e   :  { %v1088_v23 = vsel %vm382_vm0, %v2248_v22, 0.0 }
 0xb5f   :  { %1089 = vadd.xlane.f32.xlu2 %v1088_v23 }
 0xb65   :  { %v1048_v41 = vpop.xlane.xlu2 %1047 }
 0xb66   :  { %v1058_v24 = vsub.f32 %v1023_v5, %v1048_v41 }
 0xb68   :  { %v1072_v27 = vmul.f32 1.442695, %v1058_v24 }
 0xb6a   :  { %1706 = vpow2.f32 %v1072_v27 }
 0xb6b   :  { %1708 = vpow2.f32 %v1064_v31  ;;  %v1258_v31 = vperm.slane %v2270_v29, 6 }
 0xb6c   :  { %1710 = vpow2.f32 %v1066_v36 }
 0xb6d   :  { %v1051_v0 = vpop.xlane.xlu1 %1050 }
 0xb6e   :  { %v1059_v46 = vsub.f32 %v1026_v30, %v1051_v0 }
 0xb70   :  { %v1707_v32 = vpop.eup %1706  ;;  %v1074_v50 = vmul.f32 1.442695, %v1059_v46 }
 0xb71   :  { %v1094_v35 = vsel %vm382_vm0, %v1707_v32, 0.0  ;;  %v1709_v37 = vpop.eup %1708 }
 0xb72   :  { %1095 = vadd.xlane.f32.xlu0 %v1094_v35  ;;  %v1082_v40 = vsel %vm382_vm0, %v1709_v37, 0.0  ;;  %v1711_v44 = vpop.eup %1710 }
 0xb73   :  { %v1085_v48 = vsel %vm382_vm0, %v1711_v44, 0.0 }
 0xb77   :  { %1641 = vrot.lane.b32.xlu2 %v1635_v16, %s1779_s3 }
 0xb7a   :  { %1083 = vadd.xlane.f32.xlu0 %v1082_v40 }
 0xb7d   :  { %v1078_v43 = vpop.xlane.xlu2 %1077 }
 0xb7e   :  { %1712 = vrcp.f32 %v1078_v43 }
 0xb7f   :  { %1714 = vpow2.f32 %v1070_v42 }
 0xb82   :  { %1086 = vadd.xlane.f32.xlu0 %v1085_v48 }
 0xb84   :  { %v1713_v49 = vpop.eup %1712 }
 0xb85   :  { %v1108_v51 = vmul.f32 %v1713_v49, %v1701_v13  ;;  %v1637_v52 = vpop.permute.xlu1 %1636  ;;  %v1081_v54 = vpop.xlane.xlu2 %1080 }
 0xb86   :  { %v1715_v55 = vpop.eup %1714  ;;  %v1638_v56 = vunpack.i.l.bf16 %v1637_v52  ;;  %1716 = vrcp.f32 %v1081_v54  ;;  %v1639_v57 = vunpack.i.h.bf16 %v1637_v52 }
 0xb87   :  { %1574 = vmatmul.msk.f32.vlgmr.msrb.gmra.mxu3 %vm382_vm0, %v1108_v51  ;;  %1718 = vpow2.f32 %v1074_v50  ;;  %v1091_v59 = vsel %vm382_vm0, %v1715_v55, 0.0 }
 0xb88   :  { %1144 = vmatpush.msra.mxu2 %v1638_v56 }
 0xb8a   :  { %1145 = vmatpush.msra.mxu2 %v1639_v57  ;;  %1092 = vadd.xlane.f32.xlu0 %v1091_v59  ;;  %v1583_v57 = vld [vmem:[%s2393_s7 + $0x38] sm:$0xff]  ;;  %v1582_v59 = vld [vmem:[%s2393_s7 + $0x30] sm:$0xff] }
 0xb8c   :  { %v1717_v19 = vpop.eup %1716  ;;  %1335 = vmatpush.msrb.mxu2 %v1583_v57 }
 0xb8d   :  { %v1647_v60 = vpop.permute.xlu1 %1646  ;;  %v1109_v62 = vmul.f32 %v1717_v19, %v1703_v58  ;;  %v1719_v63 = vpop.eup %1718  ;;  %v1581_v19 = vld [vmem:[%s2393_s7 + $0x28] sm:$0xff] }
 0xb8e   :  { %v1648_v26 = vunpack.i.l.bf16 %v1647_v60  ;;  %v1649_v1 = vunpack.i.h.bf16 %v1647_v60  ;;  %v1097_v2 = vsel %vm382_vm0, %v1719_v63, 0.0  ;;  %1336 = vmatpush.msrb.mxu2 %v1582_v59  ;;  %v1580_v60 = vld [vmem:[%s2393_s7 + $0x20] sm:$0xff] }
 0xb8f   :  { %1575 = vmatmul.msk.f32.gmra.mxu3 %vm382_vm0, %v1109_v62 }
 0xb90   :  { %1245 = vmatpush.msrb.mxu1 %v1648_v26  ;;  %1337 = vmatpush.msrb.mxu2 %v1581_v19 }
 0xb92   :  { %1246 = vmatpush.msrb.mxu1 %v1649_v1  ;;  %1098 = vadd.xlane.f32.xlu0 %v1097_v2  ;;  %v1601_v2 = vld [vmem:[%s2394_s8 + $0xf8] sm:$0xff] }
 0xb93   :  { %1338 = vmatpush.msrb.mxu2 %v1580_v60  ;;  %1382 = vmatpush.msra.mxu3 %v1601_v2 }
 0xbd2   :  { %v1090_v20 = vpop.xlane.xlu2 %1089 }
 0xbd3   :  { %1720 = vrcp.f32 %v1090_v20  ;;  %v1600_v20 = vld [vmem:[%s2394_s8 + $0xf0] sm:$0xff] }
 0xbd4   :  { %1383 = vmatpush.msra.mxu3 %v1600_v20 }
 0xbd9   :  { %v1721_v5 = vpop.eup %1720 }
 0xbda   :  { %v1642_v3 = vpop.permute.xlu2 %1641  ;;  %v1112_v30 = vmul.f32 %v1721_v5, %v2248_v22  ;;  %v1599_v5 = vld [vmem:[%s2394_s8 + $0xe8] sm:$0xff] }
 0xbdb   :  { %v1643_v45 = vunpack.i.l.bf16 %v1642_v3  ;;  %v1644_v47 = vunpack.i.h.bf16 %v1642_v3  ;;  %1384 = vmatpush.msra.mxu3 %v1599_v5  ;;  %v1381_v5 = vperm.slane %v2209_v4, 0 }
 0xbdd   :  { %1208 = vmatpush.msra.mxu0 %v1643_v45 }
 0xbdf   :  { %1209 = vmatpush.msra.mxu0 %v1644_v47 }
 0xbe0   :  { %1576 = vmatmul.msk.f32.vlgmr.msra.gmra.mxu0 %vm382_vm0, %v1112_v30 }
 0xbe5   :  { %v1096_v6 = vpop.xlane.xlu0 %1095 }
 0xbe6   :  { %1722 = vrcp.f32 %v1096_v6  ;;  %v1598_v6 = vld [vmem:[%s2394_s8 + $0xe0] sm:$0xff] }
 0xbe7   :  { %1385 = vmatpush.msra.mxu3 %v1598_v6 }
 0xbec   :  { %v1723_v7 = vpop.eup %1722 }
 0xbed   :  { %v1114_v8 = vmul.f32 %v1723_v7, %v1707_v32  ;;  %v1084_v9 = vpop.xlane.xlu0 %1083 }
 0xbee   :  { %1724 = vrcp.f32 %v1084_v9 }
 0xbef   :  { %1578 = vmatmul.msk.f32.vlgmr.msrb.gmra.mxu1 %vm382_vm0, %v1114_v8 }
 0xbf4   :  { %v1725_v10 = vpop.eup %1724 }
 0xbf5   :  { %v1110_v12 = vmul.f32 %v1725_v10, %v1709_v37  ;;  %v1087_v13 = vpop.xlane.xlu0 %1086 }
 0xbf6   :  { %1726 = vrcp.f32 %v1087_v13 }
 0xbf7   :  { %1572 = vmatmul.msk.f32.vlgmr.msra.gmra.mxu2 %vm382_vm0, %v1110_v12  ;;  %v1305_v12 = vperm.slane %v2270_v29, 3 }
 0xbfc   :  { %v1727_v14 = vpop.eup %1726 }
 0xbfd   :  { %v1093_v15 = vpop.xlane.xlu0 %1092  ;;  %v1111_v58 = vmul.f32 %v1727_v14, %v1711_v44 }
 0xbfe   :  { %1728 = vrcp.f32 %v1093_v15  ;;  %v1308_v15 = vperm.slane %v2270_v29, 4 }
 0xbff   :  { %1573 = vmatmul.msk.f32.gmra.mxu2 %vm382_vm0, %v1111_v58 }
 0xc04   :  { %v1729_v16 = vpop.eup %1728 }
 0xc05   :  { %v1099_v61 = vpop.xlane.xlu0 %1098  ;;  %v1113_v11 = vmul.f32 %v1729_v16, %v1715_v55 }
 0xc06   :  { %1730 = vrcp.f32 %v1099_v61 }
 0xc07   :  { %1577 = vmatmul.msk.f32.gmra.mxu0 %vm382_vm0, %v1113_v11 }
 0xc0a   :  { %v1176_v21 = vpop.f32.mrf.mxu3 }
 0xc0c   :  { %v1731_v17 = vpop.eup %1730 }
 0xc0d   :  { %v1115_v18 = vmul.f32 %v1731_v17, %v1719_v63 }
 0xc0f   :  { %1579 = vmatmul.msk.f32.gmra.mxu1 %vm382_vm0, %v1115_v18 }
 0xc12   :  { %v1179_v53 = vpop.f32.mrf.mxu3 }
 0xc5d   :  { %v1211_v41 = vpop.f32.mrf.mxu0 }
 0xc6c   :  { %v1248_v25 = vpop.f32.mrf.mxu1 }
 0xc7a   :  { %v1147_v22 = vpop.f32.mrf.mxu2 }
 0xc7b   :  { %v1177_v23 = vadd.f32 %v1176_v21, %v1147_v22 }
 0xc7d   :  { %v1217_v24 = vadd.f32 %v1211_v41, %v1177_v23 }
 0xc7f   :  { %v1254_v27 = vadd.f32 %v1248_v25, %v1217_v24 }
 0xc81   :  { %v1256_v32 = vadd.f32 %v1254_v27, %v2140_v28  ;;  %v1597_v27 = vld [vmem:[%s2394_s8 + $0xd8] sm:$0xff] }
 0xc82   :  { %v1150_v35 = vpop.f32.mrf.mxu2  ;;  %1386 = vmatpush.msra.mxu3 %v1597_v27 }
 0xc83   :  { %v2274_v34 = vadd.f32 %v1258_v31, %v1256_v32  ;;  %v1180_v37 = vadd.f32 %v1179_v53, %v1150_v35  ;;  %v1595_v32 = vld [vmem:[%s2394_s8 + $0xc8] sm:$0xff]  ;;  %v1594_v35 = vld [vmem:[%s2394_s8 + $0xc0] sm:$0xff]  ;;  %v1592_v53 = vld [vmem:[%s2394_s8 + $0xb0] sm:$0xff] }
 0xc84   :  { %v1214_v39 = vpop.f32.mrf.mxu0 }
 0xc85   :  { %v1261_v36 = vsel %vm107_vm2, %v2274_v34, 0.0  ;;  %v1218_v40 = vadd.f32 %v1214_v39, %v1180_v37  ;;  %v1591_v37 = vld [vmem:[%s2394_s8 + $0xa8] sm:$0xff]  ;;  %v1590_v39 = vld [vmem:[%s2394_s8 + $0xa0] sm:$0xff] }
 0xc86   :  { %1262 = vadd.xlane.f32.xlu1 %v1261_v36  ;;  %v1593_v36 = vld [vmem:[%s2394_s8 + $0xb8] sm:$0xff] }
 0xc8c   :  { %v1251_v42 = vpop.f32.mrf.mxu1 }
 0xc8d   :  { %v1255_v0 = vadd.f32 %v1251_v42, %v1218_v40  ;;  %v1589_v40 = vld [vmem:[%s2394_s8 + $0x98] sm:$0xff]  ;;  %v1588_v42 = vld [vmem:[%s2394_s8 + $0x90] sm:$0xff] }
 0xc8f   :  { %v1257_v43 = vadd.f32 %v1255_v0, %v2145_v33  ;;  %v1587_v0 = vld [vmem:[%s2394_s8 + $0x88] sm:$0xff] }
 0xc91   :  { %v2279_v44 = vadd.f32 %v1258_v31, %v1257_v43  ;;  %v1596_v31 = vld [vmem:[%s2394_s8 + $0xd0] sm:$0xff]  ;;  %v1586_v43 = vld [vmem:[%s2394_s8 + $0x80] sm:$0xff] }
 0xc92   :  { %1387 = vmatpush.msra.mxu3 %v1596_v31 }
 0xc93   :  { %v1264_v28 = vsel %vm107_vm2, %v2279_v44, 0.0 }
 0xc94   :  { %1265 = vadd.xlane.f32.xlu0 %v1264_v28  ;;  %1388 = vmatpush.msra.mxu3 %v1595_v32  ;;  %v1316_v28 = vperm.slane %v2270_v29, 7 }
 0xc96   :  { %1389 = vmatpush.msra.mxu3 %v1594_v35 }
 0xc98   :  { %1390 = vmatpush.msra.mxu3 %v1593_v36 }
 0xc9a   :  { %1391 = vmatpush.msra.mxu3 %v1592_v53 }
 0xc9c   :  { %1392 = vmatpush.msra.mxu3 %v1591_v37 }
 0xc9e   :  { %1393 = vmatpush.msra.mxu3 %v1590_v39 }
 0xca0   :  { %1394 = vmatpush.msra.mxu3 %v1589_v40  ;;  %v1451_v40 = vperm.slane %v2209_v4, 2 }
 0xca2   :  { %1395 = vmatpush.msra.mxu3 %v1588_v42 }
 0xca4   :  { %1396 = vmatpush.msra.mxu3 %v1587_v0  ;;  %v1454_v0 = vperm.slane %v2209_v4, 3 }
 0xca6   :  { %1397 = vmatpush.msra.mxu3 %v1586_v43 }
 0xcf9   :  { %v1263_v46 = vpop.xlane.xlu1 %1262 }
 0xcfa   :  { %v1267_v48 = vmul.f32 %v1263_v46, %v1907_v38 }
 0xcfc   :  { %v1269_v49 = vsub.f32 %v2274_v34, %v1267_v48 }
 0xcfe   :  { %v1271_v50 = vmul.f32 %v1269_v49, %v1269_v49 }
 0xd00   :  { %v1273_v51 = vsel %vm107_vm2, %v1271_v50, 0.0 }
 0xd01   :  { %1274 = vadd.xlane.f32.xlu2 %v1273_v51 }
 0xd07   :  { %v1266_v52 = vpop.xlane.xlu0 %1265 }
 0xd08   :  { %v1268_v54 = vmul.f32 %v1266_v52, %v1907_v38 }
 0xd0a   :  { %v1270_v33 = vsub.f32 %v2279_v44, %v1268_v54 }
 0xd0c   :  { %v1272_v55 = vmul.f32 %v1270_v33, %v1270_v33 }
 0xd0e   :  { %v1276_v56 = vsel %vm107_vm2, %v1272_v55, 0.0 }
 0xd0f   :  { %1277 = vadd.xlane.f32.xlu0 %v1276_v56 }
 0xd74   :  { %v1275_v62 = vpop.xlane.xlu2 %1274 }
 0xd75   :  { %v1279_v63 = vmul.f32 %v1275_v62, %v1907_v38 }
 0xd77   :  { %v1281_v26 = vadd.f32 1e-05, %v1279_v63 }
 0xd79   :  { %1732 = vrsqrt.f32 %v1281_v26  ;;  %vm1289_vm0 = vweird.f32 %v1281_v26 }
 0xd7f   :  { %v1733_v1 = vpop.eup %1732 }
 0xd80   :  { %v1284_v3 = vmul.f32 %v1733_v1, %v1281_v26  ;;  %vm1290_vm10 = vweird.f32 %v1733_v1 }
 0xd81   :  { %vm1291_vm1 = vmor %vm1289_vm0, %vm1290_vm10 }
 0xd82   :  { %v1285_v45 = vmul.f32 %v1733_v1, %v1284_v3  ;;  %v1278_v47 = vpop.xlane.xlu0 %1277 }
 0xd83   :  { %v1280_v30 = vmul.f32 %v1278_v47, %v1907_v38 }
 0xd84   :  { %v1286_v7 = vmul.f32 0.5, %v1285_v45 }
 0xd85   :  { %v1282_v8 = vadd.f32 1e-05, %v1280_v30 }
 0xd86   :  { %v1287_v9 = vsub.f32 1.5, %v1286_v7 }
 0xd87   :  { %1734 = vrsqrt.f32 %v1282_v8  ;;  %vm1299_vm4 = vweird.f32 %v1282_v8 }
 0xd88   :  { %v1288_v10 = vmul.f32 %v1733_v1, %v1287_v9 }
 0xd8a   :  { %v1292_v13 = vsel %vm1291_vm1, %v1733_v1, %v1288_v10 }
 0xd8b   :  { %v1303_v14 = vmul.f32 %v1292_v13, %v1269_v49 }
 0xd8d   :  { %v1735_v58 = vpop.eup %1734  ;;  %v1306_v16 = vmul.f32 %v1305_v12, %v1303_v14 }
 0xd8e   :  { %v1294_v61 = vmul.f32 %v1735_v58, %v1282_v8  ;;  %vm1300_vm3 = vweird.f32 %v1735_v58 }
 0xd8f   :  { %v1309_v11 = vadd.f32 %v1308_v15, %v1306_v16  ;;  %vm1301_vm5 = vmor %vm1299_vm4, %vm1300_vm3 }
 0xd90   :  { %v1295_v17 = vmul.f32 %v1735_v58, %v1294_v61 }
 0xd91   :  { %1584 = vmatmul.msk.f32.vlgmr.msrb.gmra.mxu2 %vm107_vm2, %v1309_v11 }
 0xd92   :  { %v1296_v18 = vmul.f32 0.5, %v1295_v17 }
 0xd94   :  { %v1297_v21 = vsub.f32 1.5, %v1296_v18  ;;  %v1459_v18 = vld [vmem:[%s2388_s2 + $0x10] sm:$0xff] }
 0xd96   :  { %v1298_v22 = vmul.f32 %v1735_v58, %v1297_v21  ;;  %v1458_v21 = vld [vmem:[%s2388_s2 + $0x8] sm:$0xff] }
 0xd98   :  { %v1302_v23 = vsel %vm1301_vm5, %v1735_v58, %v1298_v22  ;;  %v1457_v22 = vld [vmem:[%s2388_s2] sm:$0xff] }
 0xd99   :  { %v1304_v41 = vmul.f32 %v1302_v23, %v1270_v33 }
 0xd9b   :  { %v1307_v24 = vmul.f32 %v1305_v12, %v1304_v41 }
 0xd9d   :  { %v1310_v25 = vadd.f32 %v1308_v15, %v1307_v24 }
 0xd9f   :  { %1585 = vmatmul.msk.f32.gmra.mxu2 %vm107_vm2, %v1310_v25 }
 0xe14   :  { %v1340_v46 = vpop.f32.mrf.mxu2 }
 0xe15   :  { %v1341_v48 = vadd.f32 %v1340_v46, %v1316_v28 }
 0xe17   :  { %v1348_v49 = vmul.f32 0.044715, %v1341_v48  ;;  %v1346_v19 = vmul.f32 0.5, %v1341_v48 }
 0xe19   :  { %v1350_v50 = vmul.f32 %v1348_v49, %v1341_v48 }
 0xe1b   :  { %v1352_v51 = vmul.f32 %v1350_v50, %v1341_v48 }
 0xe1d   :  { %v1354_v52 = vadd.f32 %v1352_v51, %v1341_v48 }
 0xe1f   :  { %v1356_v54 = vmul.f32 0.7978846, %v1354_v52 }
 0xe21   :  { %1736 = vtanh.f32 %v1356_v54 }
 0xe22   :  { %v1343_v33 = vpop.f32.mrf.mxu2 }
 0xe23   :  { %v1344_v55 = vadd.f32 %v1343_v33, %v1316_v28 }
 0xe25   :  { %v1349_v56 = vmul.f32 0.044715, %v1344_v55  ;;  %v1347_v2 = vmul.f32 0.5, %v1344_v55 }
 0xe27   :  { %v1737_v57 = vpop.eup %1736  ;;  %v1351_v59 = vmul.f32 %v1349_v56, %v1344_v55 }
 0xe28   :  { %v1360_v60 = vadd.f32 1.0, %v1737_v57 }
 0xe29   :  { %v1353_v62 = vmul.f32 %v1351_v59, %v1344_v55 }
 0xe2a   :  { %v1362_v63 = vmul.f32 %v1360_v60, %v1346_v19 }
 0xe2b   :  { %v1355_v26 = vadd.f32 %v1353_v62, %v1344_v55 }
 0xe2c   :  { %1398 = vmatmul.f32.vlgmr.msra.gmra.mxu3 %v1362_v63 }
 0xe2d   :  { %v1357_v29 = vmul.f32 0.7978846, %v1355_v26 }
 0xe2f   :  { %1738 = vtanh.f32 %v1357_v29 }
 0xe35   :  { %v1739_v1 = vpop.eup %1738 }
 0xe36   :  { %v1361_v20 = vadd.f32 1.0, %v1739_v1 }
 0xe38   :  { %v1363_v3 = vmul.f32 %v1361_v20, %v1347_v2 }
 0xe3a   :  { %1401 = vmatmul.f32.gmra.mxu3 %v1363_v3 }
 0xeaf   :  { %v1399_v45 = vpop.f32.mrf.mxu3 }
 0xeb0   :  { %v1400_v47 = vadd.f32 %v1399_v45, %v1381_v5 }
 0xeb2   :  { %v1405_v30 = vadd.f32 %v1400_v47, %v2274_v34 }
 0xeb4   :  { %v1407_v6 = vsel %vm107_vm2, %v1405_v30, 0.0 }
 0xeb5   :  { %1408 = vadd.xlane.f32.xlu0 %v1407_v6 }
 0xebd   :  { %v1402_v7 = vpop.f32.mrf.mxu3 }
 0xebe   :  { %v1403_v8 = vadd.f32 %v1402_v7, %v1381_v5 }
 0xec0   :  { %v1406_v9 = vadd.f32 %v1403_v8, %v2279_v44  ;;  %v1460_v44 = vld [vmem:[%s2388_s2 + $0x18] sm:$0xff]  ;;  %s1781_s2 = smov [#allocation2]  }
 0xec1   :  { %1479 = vmatpush.msrb.mxu0 %v1460_v44  ;;  %s1496_s20 = sshll.u32 %s1781_s2, 4  ;;  %s1497_s20 = int_to_ptr.vmem [resolvable:$true] %s1496_s20 }
 0xec2   :  { %v1410_v10 = vsel %vm107_vm2, %v1406_v9, 0.0 }
 0xec3   :  { %1411 = vadd.xlane.f32.xlu0 %v1410_v10  ;;  %1480 = vmatpush.msrb.mxu0 %v1459_v18 }
 0xec5   :  { %1481 = vmatpush.msrb.mxu0 %v1458_v21 }
 0xec7   :  { %1482 = vmatpush.msrb.mxu0 %v1457_v22 }
 0xf28   :  { %v1409_v12 = vpop.xlane.xlu0 %1408 }
 0xf29   :  { %v1413_v13 = vmul.f32 %v1409_v12, %v1907_v38 }
 0xf2b   :  { %v1415_v14 = vsub.f32 %v1405_v30, %v1413_v13 }
 0xf2d   :  { %v1417_v15 = vmul.f32 %v1415_v14, %v1415_v14 }
 0xf2f   :  { %v1419_v58 = vsel %vm107_vm2, %v1417_v15, 0.0 }
 0xf30   :  { %1420 = vadd.xlane.f32.xlu0 %v1419_v58 }
 0xf36   :  { %v1412_v16 = vpop.xlane.xlu0 %1411 }
 0xf37   :  { %v1414_v34 = vmul.f32 %v1412_v16, %v1907_v38 }
 0xf39   :  { %v1416_v61 = vsub.f32 %v1406_v9, %v1414_v34 }
 0xf3b   :  { %v1418_v11 = vmul.f32 %v1416_v61, %v1416_v61 }
 0xf3d   :  { %v1422_v17 = vsel %vm107_vm2, %v1418_v11, 0.0 }
 0xf3e   :  { %1423 = vadd.xlane.f32.xlu1 %v1422_v17 }
 0xfa3   :  { %v1421_v23 = vpop.xlane.xlu0 %1420 }
 0xfa4   :  { %v1425_v41 = vmul.f32 %v1421_v23, %v1907_v38 }
 0xfa6   :  { %v1427_v24 = vadd.f32 1e-05, %v1425_v41 }
 0xfa8   :  { %1740 = vrsqrt.f32 %v1427_v24  ;;  %vm1435_vm7 = vweird.f32 %v1427_v24 }
 0xfae   :  { %v1741_v25 = vpop.eup %1740 }
 0xfaf   :  { %v1430_v27 = vmul.f32 %v1741_v25, %v1427_v24  ;;  %vm1436_vm6 = vweird.f32 %v1741_v25 }
 0xfb0   :  { %vm1437_vm8 = vmor %vm1435_vm7, %vm1436_vm6 }
 0xfb1   :  { %v1431_v31 = vmul.f32 %v1741_v25, %v1430_v27  ;;  %v1424_v32 = vpop.xlane.xlu1 %1423 }
 0xfb2   :  { %v1426_v35 = vmul.f32 %v1424_v32, %v1907_v38 }
 0xfb3   :  { %v1432_v36 = vmul.f32 0.5, %v1431_v31 }
 0xfb4   :  { %v1428_v53 = vadd.f32 1e-05, %v1426_v35 }
 0xfb5   :  { %v1433_v37 = vsub.f32 1.5, %v1432_v36 }
 0xfb6   :  { %1742 = vrsqrt.f32 %v1428_v53  ;;  %vm1445_vm11 = vweird.f32 %v1428_v53 }
 0xfb7   :  { %v1434_v39 = vmul.f32 %v1741_v25, %v1433_v37 }
 0xfb9   :  { %v1438_v42 = vsel %vm1437_vm8, %v1741_v25, %v1434_v39 }
 0xfba   :  { %v1449_v43 = vmul.f32 %v1438_v42, %v1415_v14 }
 0xfbc   :  { %v1743_v28 = vpop.eup %1742  ;;  %v1452_v46 = vmul.f32 %v1451_v40, %v1449_v43 }
 0xfbd   :  { %v1440_v48 = vmul.f32 %v1743_v28, %v1428_v53  ;;  %vm1446_vm9 = vweird.f32 %v1743_v28 }
 0xfbe   :  { %v1455_v49 = vadd.f32 %v1454_v0, %v1452_v46  ;;  %vm1447_vm12 = vmor %vm1445_vm11, %vm1446_vm9 }
 0xfbf   :  { %v1441_v50 = vmul.f32 %v1743_v28, %v1440_v48 }
 0xfc0   :  { %1602 = vmatmul.msk.f32.vlgmr.msrb.gmra.mxu0 %vm107_vm2, %v1455_v49 }
 0xfc1   :  { %v1442_v38 = vmul.f32 0.5, %v1441_v50 }
 0xfc3   :  { %v1443_v51 = vsub.f32 1.5, %v1442_v38 }
 0xfc5   :  { %v1444_v52 = vmul.f32 %v1743_v28, %v1443_v51 }
 0xfc7   :  { %v1448_v54 = vsel %vm1447_vm12, %v1743_v28, %v1444_v52 }
 0xfc8   :  { %v1450_v33 = vmul.f32 %v1448_v54, %v1416_v61 }
 0xfca   :  { %v1453_v55 = vmul.f32 %v1451_v40, %v1450_v33 }
 0xfcc   :  { %v1456_v56 = vadd.f32 %v1454_v0, %v1453_v55 }
 0xfce   :  { %1603 = vmatmul.msk.f32.gmra.mxu0 %vm107_vm2, %v1456_v56 }
0x103d   :  { %v1484_v4 = vpop.f32.mrf.mxu0 }
0x103e   :  { %1490 = vst [vmem:[#allocation2] sm:$0xff] %v1484_v4 }
0x104b   :  { %v1487_v57 = vpop.f32.mrf.mxu0 }
0x104c   :  { %1491 = vst [vmem:[#allocation2 + $0x8] sm:$0xff] %v1487_v57 }
0x104d   :  { %1504 = dma.vmem_to_hbm [thread:$0]  %s1497_s20, 256, %s1499_s27, [#allocation3], %s1782_s28, %s1782_s28, %s1783_s5  }
0x104e   :  { %1769 = dma.done.wait [#allocation3], 256  }
0x104f   :  { %1770 = vsyncadd [#allocation3], 4294967040 }
0x1050   :  { %1509 = vsyncpa [#allocation3], 1 }

</bundles_post_ra>
